<compile_context>
chip_gen: v5e
topology: v5e:2x2
jax: 0.10.0
libtpu: 0.0.40
codegen_flags: <defaults>
</compile_context>

<pallas_src>
import jax
import jax.numpy as jnp
import numpy as np
from jax.experimental import pallas as pl
from jax.experimental.pallas import tpu as pltpu


def _round_up(x, m):
    return (x + m - 1) // m * m


def _naive_gate_kernel(x_ref, w_ref, b_ref, idx_ref, score_ref, *gate_ref):
    # x_ref:     (TM, D)       token tile (activation dtype, f32/bf16)
    # w_ref:     (D, E_pad)    pre-transposed, expert-padded gate weight
    # b_ref:     (1, E_pad)    f32 bias (padded experts = -1e30)
    # idx_ref:   (top_k, TM)   int32 top-k indices (lane-dense / transposed)
    # score_ref: (top_k, TM)   f32 softmax over the top-k logits (lane-dense)
    # gate_ref:  optional (TM, E_pad) full logits (return_all_scores=True)
    top_k = idx_ref.shape[0]
    tm = x_ref.shape[0]

    # MXU matmul in the activation dtype with an f32 accumulator.
    gate = jnp.dot(x_ref[...], w_ref[...],
                   preferred_element_type=jnp.float32) + b_ref[...]

    if gate_ref:  # only materialized when return_all_scores=True
        gate_ref[0][...] = gate.astype(gate_ref[0].dtype)

    e_pad = gate.shape[-1]
    nbits = max(1, (e_pad - 1).bit_length())
    low_mask = (1 << nbits) - 1          # index bits stolen from the mantissa

    # Monotonic int32 key (order(key) == order(float)); pack (e_pad-1-lane)
    # into the low bits so a SINGLE max reduce yields value + index, with
    # lowest-index tie-break.
    bits = pltpu.bitcast(gate, jnp.int32)
    key = jnp.where(bits < 0, bits ^ 0x7FFFFFFF, bits)
    lane = jax.lax.broadcasted_iota(jnp.int32, (1, e_pad), 1)   # (1, E), bcast
    packed = (key & ~low_mask) | ((e_pad - 1) - lane)

    vals, idxs = [], []
    for _ in range(top_k):
        pmax = jnp.max(packed, axis=-1, keepdims=True)          # one XLU reduce
        sel = (e_pad - 1) - (pmax & low_mask)                   # (TM, 1)
        vkey = pmax & ~low_mask
        vbits = jnp.where(vkey < 0, vkey ^ 0x7FFFFFFF, vkey)
        vals.append(pltpu.bitcast(vbits, jnp.float32))          # ~2^-17 rel approx
        idxs.append(sel)
        packed = jnp.where(lane == sel, -(2 ** 31), packed)     # mask winner

    # Softmax over the selected logits; selection is descending, so vals[0] is
    # the row max (no extra reduce).  EUP exp + approx reciprocal + Newton step.
    exps = [jnp.exp(v - vals[0]) for v in vals]
    denom = exps[0]
    for ex in exps[1:]:
        denom = denom + ex
    inv = pl.reciprocal(denom, approx=True)
    inv = inv * (2.0 - denom * inv)                             # refine to ~f32
    scores = [ex * inv for ex in exps]

    # Lane-dense stores: transpose the tiny (TM, k) results to (k, TM) so the
    # output writes are unmasked 128-lane stores and writeback DMA is dense.
    # Pad to 8 columns for an aligned transpose, then slice the real rows.
    pad = max(8, top_k) - top_k
    zi = jnp.zeros((tm, 1), jnp.int32)
    zf = jnp.zeros((tm, 1), jnp.float32)
    idx_t = jnp.concatenate(idxs + [zi] * pad, axis=-1).T       # (8, TM)
    sc_t = jnp.concatenate(scores + [zf] * pad, axis=-1).T      # (8, TM)
    idx_ref[...] = idx_t[:top_k, :]
    score_ref[...] = sc_t[:top_k, :].astype(score_ref.dtype)


def naive_gate_forward(inp, weight, bias, *, top_k=2, return_all_scores=False,
                       tile_m=None, vmem_limit_bytes=48 * 1024 * 1024):
    """JAX/Pallas equivalent of NaiveGate.forward.

    inp:    (..., d_model) activations (f32 or bf16)
    weight: (num_adapter, d_model)  -- nn.Linear layout
    bias:   (num_adapter,)
    """
    orig_lead = inp.shape[:-1]
    d_model = inp.shape[-1]
    num_adapter = weight.shape[0]
    assert top_k <= num_adapter

    x = inp.reshape(-1, d_model)
    n_tok = x.shape[0]
    x_itemsize = jnp.dtype(x.dtype).itemsize

    # Lane-dense expert dimension: pad E to a multiple of 128 (exactly fills
    # the 128-wide MXU on v5e).
    e_pad = _round_up(num_adapter, 128)

    # ---- tile size selection -------------------------------------------------
    if tile_m is None:
        # ~4 MiB of x per tile keeps the kernel at the HBM roofline and
        # amortizes the ~0.35 us per-grid-step overhead (v6e feedback).
        tile_m = (4 * 1024 * 1024) // max(1, d_model * x_itemsize)
        tile_m = max(256, min(2048, tile_m // 128 * 128))
    # Lane-dense transposed outputs require tile_m % 128 == 0.
    tile_m = max(128, tile_m // 128 * 128)
    # Keep >= ~4 grid steps (v7x megacore sharding + pipeline depth) and never
    # exceed the padded token count.
    tile_m = min(tile_m,
                 max(128, _round_up(-(-n_tok // 4), 128)),
                 _round_up(n_tok, 128))

    def _vmem_estimate(tm):
        est = 2 * tm * d_model * x_itemsize            # x tile, double-buffered
        est += 2 * tm * e_pad * 4                      # f32 gate + i32 key temps
        est += 2 * 2 * 8 * tm * 4                      # idx/score blocks (sublane pad, 2-buf)
        if return_all_scores:
            est += 2 * tm * e_pad * x_itemsize         # full-logits out block
        est += 2 * (d_model + 8) * e_pad * x_itemsize  # W^T (+bias), double-buffered
        return est

    while tile_m > 128 and _vmem_estimate(tile_m) > 0.7 * vmem_limit_bytes:
        tile_m = max(128, (tile_m // 2) // 128 * 128)

    n_pad = _round_up(n_tok, tile_m)

    # One-time wrapper-side transpose + expert padding; weight in the
    # activation dtype so bf16 activations feed the MXU in bf16.
    w_t = weight.astype(x.dtype).T                                  # (D, E)
    if e_pad != num_adapter:
        w_t = jnp.pad(w_t, ((0, 0), (0, e_pad - num_adapter)))
        b_p = jnp.pad(bias.astype(jnp.float32), (0, e_pad - num_adapter),
                      constant_values=-1e30)                        # padded never wins
    else:
        b_p = bias.astype(jnp.float32)
    b_p = b_p.reshape(1, e_pad)

    if n_pad != n_tok:
        x = jnp.pad(x, ((0, n_pad - n_tok), (0, 0)))

    out_shape = [
        jax.ShapeDtypeStruct((top_k, n_pad), jnp.int32),
        jax.ShapeDtypeStruct((top_k, n_pad), jnp.float32),
    ]
    out_specs = [
        pl.BlockSpec((top_k, tile_m), lambda i: (0, i)),
        pl.BlockSpec((top_k, tile_m), lambda i: (0, i)),
    ]
    if return_all_scores:
        out_shape.append(jax.ShapeDtypeStruct((n_pad, e_pad), x.dtype))
        out_specs.append(pl.BlockSpec((tile_m, e_pad), lambda i: (i, 0)))

    bytes_accessed = (n_pad * d_model * x_itemsize        # read x
                      + d_model * e_pad * x_itemsize      # read W^T
                      + e_pad * 4                         # read bias
                      + n_pad * top_k * (4 + 4))          # write idx + score
    if return_all_scores:
        bytes_accessed += n_pad * e_pad * x_itemsize      # write full logits

    outs = pl.pallas_call(
        _naive_gate_kernel,
        out_shape=tuple(out_shape),
        grid_spec=pltpu.PrefetchScalarGridSpec(
            num_scalar_prefetch=0,
            grid=(n_pad // tile_m,),
            in_specs=[
                pl.BlockSpec((tile_m, d_model), lambda i: (i, 0)),   # x tile
                pl.BlockSpec((d_model, e_pad), lambda i: (0, 0)),    # W^T (whole)
                pl.BlockSpec((1, e_pad), lambda i: (0, 0)),          # bias
            ],
            out_specs=out_specs,
        ),
        compiler_params=pltpu.CompilerParams(
            dimension_semantics=("parallel",),
            vmem_limit_bytes=vmem_limit_bytes),
        cost_estimate=pl.CostEstimate(
            flops=2 * n_pad * d_model * e_pad,
            transcendentals=n_pad * (top_k + 1),
            bytes_accessed=bytes_accessed),
    )(x, w_t, b_p)

    # Undo the lane-dense transpose + padding in the wrapper (tiny tensors).
    gate_top_k_idx = outs[0][:, :n_tok].T.reshape(*orig_lead, top_k)
    gate_score = outs[1][:, :n_tok].T.reshape(-1, top_k)   # .view(-1, k) in torch
    if return_all_scores:
        gate = outs[2][:n_tok, :num_adapter].reshape(*orig_lead, num_adapter)
        return gate_top_k_idx, gate_score, gate
    return gate_top_k_idx, gate_score


def _check(inp, weight, bias, idx, score, gate=None, top_k=2):
    """Pure-numpy reference check, robust to near-tie index swaps."""
    d = inp.shape[-1]
    e = weight.shape[0]
    x = np.asarray(inp, np.float64).reshape(-1, d)
    w = np.asarray(weight, np.float64)
    b = np.asarray(bias, np.float64)
    logits = x @ w.T + b

    order = np.argsort(-logits, axis=-1, kind="stable")
    ref_idx = order[:, :top_k]
    ref_vals = np.take_along_axis(logits, ref_idx, axis=-1)
    ref_score = np.exp(ref_vals - ref_vals[:, :1])
    ref_score /= ref_score.sum(-1, keepdims=True)

    idx_np = np.asarray(idx).reshape(-1, top_k)
    score_np = np.asarray(score).reshape(-1, top_k)

    # Selected logits equal the true top-k values (covers all rows).
    sel_vals = np.take_along_axis(logits, idx_np, axis=-1)
    np.testing.assert_allclose(sel_vals, ref_vals, rtol=1e-3, atol=1e-3)
    # Exact index equality on rows whose top-(k+1) gaps are unambiguous.
    svals = -np.sort(-logits, axis=-1)
    ok = (svals[:, :top_k] - svals[:, 1:top_k + 1]).min(-1) > 1e-2
    np.testing.assert_array_equal(idx_np[ok], ref_idx[ok])
    # Softmax scores.
    np.testing.assert_allclose(score_np, ref_score, rtol=1e-3, atol=1e-3)
    if gate is not None:
        np.testing.assert_allclose(np.asarray(gate).reshape(-1, e), logits,
                                   rtol=1e-3, atol=1e-3)


if __name__ == "__main__":
    # Small deterministic example consistent with the module:
    # batch=2, seq=8, d_model=32, num_adapter=8, top_k=2.
    B, S, D, E, K = 2, 8, 32, 8, 2

    key = jax.random.PRNGKey(0)
    k_inp, k_w, k_b = jax.random.split(key, 3)

    inp = jax.random.normal(k_inp, (B, S, D), dtype=jnp.float32)
    # nn.Linear(d_model, num_adapter): weight (E, D), bias (E,)
    weight = jax.random.normal(k_w, (E, D), dtype=jnp.float32) * 0.1
    bias = jax.random.normal(k_b, (E,), dtype=jnp.float32) * 0.1

    idx, score, gate = naive_gate_forward(
        inp, weight, bias, top_k=K, return_all_scores=True)
    jax.block_until_ready((idx, score, gate))
    assert idx.shape == (B, S, K) and score.shape == (B * S, K)
    assert gate.shape == (B, S, E)
    _check(inp, weight, bias, idx, score, gate, top_k=K)

    # Second call: non-multiple-of-tile token count and no full scores
    # (exercises the token-padding / sliced-output path).
    inp2 = jax.random.normal(jax.random.PRNGKey(1), (3, 5, D), dtype=jnp.float32)
    idx2, score2 = naive_gate_forward(inp2, weight, bias, top_k=K)
    jax.block_until_ready((idx2, score2))
    _check(inp2, weight, bias, idx2, score2, top_k=K)

    # TODO(synk): the surrounding MOARecRobertaEncoder stack (attention, FFN,
    # LoRA adapters, LayerNorm, dropout) is standard dense compute left to XLA;
    # only the NaiveGate MoE router is implemented as a Pallas kernel here.
    print("KERNEL_OK")
</pallas_src>

<mosaic_0001>
module attributes {stable_mosaic.version = 11 : i64} {
  func.func @_naive_gate_kernel(%arg0: i32, %arg1: memref<128x32xf32, #tpu.memory_space<vmem>>, %arg2: memref<32x128xf32, #tpu.memory_space<vmem>>, %arg3: memref<1x128xf32, #tpu.memory_space<vmem>>, %arg4: memref<2x128xi32, #tpu.memory_space<vmem>>, %arg5: memref<2x128xf32, #tpu.memory_space<vmem>>, %arg6: memref<128x128xf32, #tpu.memory_space<vmem>>) attributes {dimension_semantics = [#tpu.dimension_semantics<parallel>], iteration_bounds = array<i64: 1>, scalar_prefetch = 0 : i64, scratch_operands = 0 : i64, tpu.core_type = #tpu.core_type<tc>, window_params = [{transform_indices = @transform_0, window_bounds = array<i64: 128, 32>}, {pipeline_mode = #tpu.pipeline_mode<synchronous>, transform_indices = @transform_1, window_bounds = array<i64: 32, 128>}, {pipeline_mode = #tpu.pipeline_mode<synchronous>, transform_indices = @transform_2, window_bounds = array<i64: 1, 128>}, {transform_indices = @transform_3, window_bounds = array<i64: 2, 128>}, {transform_indices = @transform_4, window_bounds = array<i64: 2, 128>}, {transform_indices = @transform_5, window_bounds = array<i64: 128, 128>}]} {
    %c0 = arith.constant 0 : index
    %c0_0 = arith.constant 0 : index
    %0 = vector.load %arg1[%c0, %c0_0] : memref<128x32xf32, #tpu.memory_space<vmem>>, vector<128x32xf32>
    %c0_1 = arith.constant 0 : index
    %c0_2 = arith.constant 0 : index
    %1 = vector.load %arg2[%c0_1, %c0_2] : memref<32x128xf32, #tpu.memory_space<vmem>>, vector<32x128xf32>
    %cst = arith.constant dense<0.000000e+00> : vector<128x128xf32>
    %2 = tpu.matmul %0, %1, %cst {dimension_numbers = #tpu.dot_dimension_numbers<[1], [0], [0], [1], [0, 0, 1, 1], [], []>} : vector<128x32xf32>, vector<32x128xf32>, vector<128x128xf32> -> vector<128x128xf32>
    %c0_3 = arith.constant 0 : index
    %c0_4 = arith.constant 0 : index
    %3 = vector.load %arg3[%c0_3, %c0_4] : memref<1x128xf32, #tpu.memory_space<vmem>>, vector<1x128xf32>
    %4 = vector.broadcast %3 : vector<1x128xf32> to vector<128x128xf32>
    %5 = arith.addf %2, %4 : vector<128x128xf32>
    %c0_5 = arith.constant 0 : index
    %c0_6 = arith.constant 0 : index
    %6 = vector.load %arg6[%c0_5, %c0_6] : memref<128x128xf32, #tpu.memory_space<vmem>>, vector<128x128xf32>
    tpu.vector_store %arg6[%c0_5, %c0_6], %5 {strides = array<i32>} : memref<128x128xf32, #tpu.memory_space<vmem>>, vector<128x128xf32>,
    %7 = tpu.bitcast %5 : vector<128x128xf32> -> vector<128x128xi32>
    %c0_i32 = arith.constant 0 : i32
    %8 = vector.broadcast %c0_i32 : i32 to vector<128x128xi32>
    %9 = arith.cmpi slt, %7, %8 : vector<128x128xi32>
    %c2147483647_i32 = arith.constant 2147483647 : i32
    %10 = vector.broadcast %c2147483647_i32 : i32 to vector<128x128xi32>
    %11 = arith.xori %7, %10 : vector<128x128xi32>
    %12 = arith.select %9, %11, %7 : vector<128x128xi1>, vector<128x128xi32>
    %13 = tpu.iota {dimensions = array<i32: 1>} : vector<1x128xi32>
    %c-128_i32 = arith.constant -128 : i32
    %14 = vector.broadcast %c-128_i32 : i32 to vector<128x128xi32>
    %15 = arith.andi %12, %14 : vector<128x128xi32>
    %c127_i32 = arith.constant 127 : i32
    %16 = vector.broadcast %c127_i32 : i32 to vector<1x128xi32>
    %17 = arith.subi %16, %13 : vector<1x128xi32>
    %18 = vector.broadcast %17 : vector<1x128xi32> to vector<128x128xi32>
    %19 = arith.ori %15, %18 : vector<128x128xi32>
    %cst_7 = arith.constant dense<-2147483648> : vector<128xi32>
    %20 = vector.multi_reduction <maxsi>, %19, %cst_7 [1] : vector<128x128xi32> to vector<128xi32>
    %21 = vector.shape_cast %20 : vector<128xi32> to vector<128x1xi32>
    %c127_i32_8 = arith.constant 127 : i32
    %22 = vector.broadcast %c127_i32_8 : i32 to vector<128x1xi32>
    %23 = arith.andi %21, %22 : vector<128x1xi32>
    %c127_i32_9 = arith.constant 127 : i32
    %24 = vector.broadcast %c127_i32_9 : i32 to vector<128x1xi32>
    %25 = arith.subi %24, %23 : vector<128x1xi32>
    %c-128_i32_10 = arith.constant -128 : i32
    %26 = vector.broadcast %c-128_i32_10 : i32 to vector<128x1xi32>
    %27 = arith.andi %21, %26 : vector<128x1xi32>
    %c0_i32_11 = arith.constant 0 : i32
    %28 = vector.broadcast %c0_i32_11 : i32 to vector<128x1xi32>
    %29 = arith.cmpi slt, %27, %28 : vector<128x1xi32>
    %c2147483647_i32_12 = arith.constant 2147483647 : i32
    %30 = vector.broadcast %c2147483647_i32_12 : i32 to vector<128x1xi32>
    %31 = arith.xori %27, %30 : vector<128x1xi32>
    %32 = arith.select %29, %31, %27 : vector<128x1xi1>, vector<128x1xi32>
    %33 = tpu.bitcast %32 : vector<128x1xi32> -> vector<128x1xf32>
    %34 = vector.broadcast %13 : vector<1x128xi32> to vector<128x128xi32>
    %35 = vector.broadcast %25 : vector<128x1xi32> to vector<128x128xi32>
    %36 = arith.cmpi eq, %34, %35 : vector<128x128xi32>
    %c-2147483648_i32 = arith.constant -2147483648 : i32
    %37 = vector.broadcast %c-2147483648_i32 : i32 to vector<128x128xi32>
    %38 = arith.select %36, %37, %19 : vector<128x128xi1>, vector<128x128xi32>
    %cst_13 = arith.constant dense<-2147483648> : vector<128xi32>
    %39 = vector.multi_reduction <maxsi>, %38, %cst_13 [1] : vector<128x128xi32> to vector<128xi32>
    %40 = vector.shape_cast %39 : vector<128xi32> to vector<128x1xi32>
    %c127_i32_14 = arith.constant 127 : i32
    %41 = vector.broadcast %c127_i32_14 : i32 to vector<128x1xi32>
    %42 = arith.andi %40, %41 : vector<128x1xi32>
    %c127_i32_15 = arith.constant 127 : i32
    %43 = vector.broadcast %c127_i32_15 : i32 to vector<128x1xi32>
    %44 = arith.subi %43, %42 : vector<128x1xi32>
    %c-128_i32_16 = arith.constant -128 : i32
    %45 = vector.broadcast %c-128_i32_16 : i32 to vector<128x1xi32>
    %46 = arith.andi %40, %45 : vector<128x1xi32>
    %c0_i32_17 = arith.constant 0 : i32
    %47 = vector.broadcast %c0_i32_17 : i32 to vector<128x1xi32>
    %48 = arith.cmpi slt, %46, %47 : vector<128x1xi32>
    %c2147483647_i32_18 = arith.constant 2147483647 : i32
    %49 = vector.broadcast %c2147483647_i32_18 : i32 to vector<128x1xi32>
    %50 = arith.xori %46, %49 : vector<128x1xi32>
    %51 = arith.select %48, %50, %46 : vector<128x1xi1>, vector<128x1xi32>
    %52 = tpu.bitcast %51 : vector<128x1xi32> -> vector<128x1xf32>
    %53 = arith.subf %33, %33 : vector<128x1xf32>
    %54 = math.exp %53 : vector<128x1xf32>
    %55 = arith.subf %52, %33 : vector<128x1xf32>
    %56 = math.exp %55 : vector<128x1xf32>
    %57 = arith.addf %54, %56 : vector<128x1xf32>
    %58 = tpu.reciprocal %57 {approx = true} : vector<128x1xf32> -> vector<128x1xf32>
    %59 = arith.mulf %57, %58 : vector<128x1xf32>
    %cst_19 = arith.constant 2.000000e+00 : f32
    %60 = vector.broadcast %cst_19 : f32 to vector<128x1xf32>
    %61 = arith.subf %60, %59 : vector<128x1xf32>
    %62 = arith.mulf %58, %61 : vector<128x1xf32>
    %63 = arith.mulf %54, %62 : vector<128x1xf32>
    %64 = arith.mulf %56, %62 : vector<128x1xf32>
    %c0_i32_20 = arith.constant 0 : i32
    %65 = vector.broadcast %c0_i32_20 : i32 to vector<128x1xi32>
    %cst_21 = arith.constant 0.000000e+00 : f32
    %66 = vector.broadcast %cst_21 : f32 to vector<128x1xf32>
    %67 = tpu.concatenate %25, %44, %65, %65, %65, %65, %65, %65 in 1 : vector<128x1xi32>, vector<128x1xi32>, vector<128x1xi32>, vector<128x1xi32>, vector<128x1xi32>, vector<128x1xi32>, vector<128x1xi32>, vector<128x1xi32> -> vector<128x8xi32>
    %68 = tpu.transpose %67, [1, 0] : vector<128x8xi32> -> vector<8x128xi32>
    %69 = tpu.concatenate %63, %64, %66, %66, %66, %66, %66, %66 in 1 : vector<128x1xf32>, vector<128x1xf32>, vector<128x1xf32>, vector<128x1xf32>, vector<128x1xf32>, vector<128x1xf32>, vector<128x1xf32>, vector<128x1xf32> -> vector<128x8xf32>
    %70 = tpu.transpose %69, [1, 0] : vector<128x8xf32> -> vector<8x128xf32>
    %71 = vector.extract_strided_slice %68 {offsets = [0, 0], sizes = [2, 128], strides = [1, 1]} : vector<8x128xi32> to vector<2x128xi32>
    %c0_22 = arith.constant 0 : index
    %c0_23 = arith.constant 0 : index
    %72 = vector.load %arg4[%c0_22, %c0_23] : memref<2x128xi32, #tpu.memory_space<vmem>>, vector<2x128xi32>
    tpu.vector_store %arg4[%c0_22, %c0_23], %71 {strides = array<i32>} : memref<2x128xi32, #tpu.memory_space<vmem>>, vector<2x128xi32>,
    %73 = vector.extract_strided_slice %70 {offsets = [0, 0], sizes = [2, 128], strides = [1, 1]} : vector<8x128xf32> to vector<2x128xf32>
    %c0_24 = arith.constant 0 : index
    %c0_25 = arith.constant 0 : index
    %74 = vector.load %arg5[%c0_24, %c0_25] : memref<2x128xf32, #tpu.memory_space<vmem>>, vector<2x128xf32>
    tpu.vector_store %arg5[%c0_24, %c0_25], %73 {strides = array<i32>} : memref<2x128xf32, #tpu.memory_space<vmem>>, vector<2x128xf32>,
    return
  }
  func.func @transform_0(%arg0: i32) -> (i32, i32) {
    %c0_i32 = arith.constant 0 : i32
    %c0_i32_0 = arith.constant 0 : i32
    return %arg0, %c0_i32 : i32, i32
  }
  func.func @transform_1(%arg0: i32) -> (i32, i32) {
    %c0_i32 = arith.constant 0 : i32
    %c0_i32_0 = arith.constant 0 : i32
    %c0_i32_1 = arith.constant 0 : i32
    return %c0_i32, %c0_i32_0 : i32, i32
  }
  func.func @transform_2(%arg0: i32) -> (i32, i32) {
    %c0_i32 = arith.constant 0 : i32
    %c0_i32_0 = arith.constant 0 : i32
    %c0_i32_1 = arith.constant 0 : i32
    return %c0_i32, %c0_i32_0 : i32, i32
  }
  func.func @transform_3(%arg0: i32) -> (i32, i32) {
    %c0_i32 = arith.constant 0 : i32
    %c0_i32_0 = arith.constant 0 : i32
    return %c0_i32, %arg0 : i32, i32
  }
  func.func @transform_4(%arg0: i32) -> (i32, i32) {
    %c0_i32 = arith.constant 0 : i32
    %c0_i32_0 = arith.constant 0 : i32
    return %c0_i32, %arg0 : i32, i32
  }
  func.func @transform_5(%arg0: i32) -> (i32, i32) {
    %c0_i32 = arith.constant 0 : i32
    %c0_i32_0 = arith.constant 0 : i32
    return %arg0, %c0_i32 : i32, i32
  }
}

</mosaic_0001>

<bundles_post_ra>
// kernel: tpu_custom_call.1
= control target key start
LH: loop header
LB: loop body
LE: loop exit
PB: predicated region body
PF: predicated region fallthrough
CT: control target
= control target key end

     0   :  { %11 = vsyncpa [#allocation3], 0  ;;  %vm43_vm0 = vcmask 261120   ;;  %s2909_s0 = inlined_call_operand.vmem [shape: f32[128,32], index: 0, kind: input, shape index: {}]   ;;  %s2910_s1 = inlined_call_operand.vmem [shape: f32[32,128], index: 1, kind: input, shape index: {}]   ;;  %s2911_s2 = inlined_call_operand.vmem [shape: f32[1,128], index: 2, kind: input, shape index: {}]   ;;  %s2912_s3 = inlined_call_operand.hbm [shape: s32[2,128], index: 3, kind: output, shape index: {0}]   ;;  %s2913_s4 = inlined_call_operand.hbm [shape: f32[2,128], index: 4, kind: output, shape index: {1}]   ;;  %s2914_s5 = inlined_call_operand.hbm [shape: f32[128,128], index: 5, kind: output, shape index: {2}]  }
   0x1   :  { %v38_v0 = vld [vmem:[%s2910_s1 + $0x18] sm:$0xff]  ;;  %v37_v1 = vld [vmem:[%s2910_s1 + $0x10] sm:$0xff]  ;;  %v36_v2 = vld [vmem:[%s2910_s1 + $0x8] sm:$0xff] }
   0x2   :  { %104 = vmatpush.msra.mxu0 %v38_v0  ;;  %1546 = vmatpush.msra.mxu1 %v38_v0  ;;  %v35_v3 = vld [vmem:[%s2910_s1] sm:$0xff] }
   0x3   :  { %1547 = vmatpush.msra.mxu2 %v38_v0  ;;  %1548 = vmatpush.msra.mxu3 %v38_v0  ;;  %v19_v4 = vld [vmem:[%s2909_s0] sm:$0xff] }
   0x4   :  { %105 = vmatpush.msra.mxu0 %v37_v1  ;;  %1549 = vmatpush.msra.mxu1 %v37_v1  ;;  %v23_v5 = vld [vmem:[%s2909_s0 + $0x20] sm:$0xff] }
   0x5   :  { %1550 = vmatpush.msra.mxu2 %v37_v1  ;;  %1551 = vmatpush.msra.mxu3 %v37_v1  ;;  %v27_v6 = vld [vmem:[%s2909_s0 + $0x40] sm:$0xff] }
   0x6   :  { %106 = vmatpush.msra.mxu0 %v36_v2  ;;  %1552 = vmatpush.msra.mxu1 %v36_v2 }
   0x7   :  { %1553 = vmatpush.msra.mxu2 %v36_v2  ;;  %1554 = vmatpush.msra.mxu3 %v36_v2 }
   0x8   :  { %107 = vmatpush.msra.mxu0 %v35_v3  ;;  %1555 = vmatpush.msra.mxu1 %v35_v3 }
   0x9   :  { %12 = vsyncpa [#allocation5], 0  ;;  %1556 = vmatpush.msra.mxu2 %v35_v3  ;;  %1530 = vmatmul.msk.f32.vlgmr.msra.gmra.mxu0 %vm43_vm0, %v19_v4  ;;  %v31_v7 = vld [vmem:[%s2909_s0 + $0x60] sm:$0xff]  ;;  %v20_v8 = vld [vmem:[%s2909_s0 + $0x8] sm:$0xff]  ;;  %v237_v20 = vlaneseq  ;;  %s1488_s10 = sshll.u32 %s2912_s3, 4  ;;  %s1737_s11 = smov [#allocation4]   ;;  %s1489_s10 = int_to_ptr.hbm [resolvable:$true] %s1488_s10 }
   0xa   :  { %1534 = vmatmul.msk.f32.vlgmr.msra.gmra.mxu1 %vm43_vm0, %v23_v5  ;;  %1538 = vmatmul.msk.f32.vlgmr.msra.gmra.mxu2 %vm43_vm0, %v27_v6  ;;  %v28_v9 = vld [vmem:[%s2909_s0 + $0x48] sm:$0xff]  ;;  %v21_v12 = vld [vmem:[%s2909_s0 + $0x10] sm:$0xff]  ;;  %v22_v16 = vld [vmem:[%s2909_s0 + $0x18] sm:$0xff]  ;;  %s1497_s12 = sshll.u32 %s1737_s11, 4  ;;  %s1499_s15 = sshll.u32 %s2913_s4, 4  ;;  %s1498_s12 = int_to_ptr.vmem [resolvable:$true] %s1497_s12  ;;  %s1500_s15 = int_to_ptr.hbm [resolvable:$true] %s1499_s15 }
   0xb   :  { %1557 = vmatpush.msra.mxu3 %v35_v3  ;;  %v24_v10 = vld [vmem:[%s2909_s0 + $0x28] sm:$0xff]  ;;  %v25_v13 = vld [vmem:[%s2909_s0 + $0x30] sm:$0xff]  ;;  %v26_v17 = vld [vmem:[%s2909_s0 + $0x38] sm:$0xff]  ;;  %v1852_v23 = vand.u32 127, %v237_v20  ;;  %s1738_s16 = smov [#allocation6]   ;;  %s1509_s20 = sshll.u32 %s2914_s5, 4  ;;  %s1510_s20 = int_to_ptr.hbm [resolvable:$true] %s1509_s20 }
   0xc   :  { %1542 = vmatmul.msk.f32.vlgmr.msra.gmra.mxu3 %vm43_vm0, %v31_v7  ;;  %v32_v11 = vld [vmem:[%s2909_s0 + $0x68] sm:$0xff]  ;;  %v29_v14 = vld [vmem:[%s2909_s0 + $0x50] sm:$0xff]  ;;  %v30_v18 = vld [vmem:[%s2909_s0 + $0x58] sm:$0xff]  ;;  %s1507_s17 = sshll.u32 %s1738_s16, 4  ;;  %s1739_s3 = smov 128   ;;  %s1508_s17 = int_to_ptr.vmem [resolvable:$true] %s1507_s17 }
   0xd   :  { %v33_v15 = vld [vmem:[%s2909_s0 + $0x70] sm:$0xff]  ;;  %v34_v19 = vld [vmem:[%s2909_s0 + $0x78] sm:$0xff]  ;;  %v1850_v21 = vld [vmem:[%s2911_s2] ss:$0 sm:$0xff]  ;;  %v1857_v29 = vsub.s32 127, %v1852_v23  ;;  %s1736_s0 = smov [#allocation2]  }
   0xe   :  { %s1486_s2 = sshll.u32 %s1736_s0, 4  ;;  %s1740_s21 = smov 8   ;;  %s1487_s2 = int_to_ptr.vmem [resolvable:$true] %s1486_s2 }
  0x11   :  { %1531 = vmatmul.msk.f32.gmra.mxu0 %vm43_vm0, %v20_v8 }
  0x12   :  { %1539 = vmatmul.msk.f32.gmra.mxu2 %vm43_vm0, %v28_v9  ;;  %1535 = vmatmul.msk.f32.gmra.mxu1 %vm43_vm0, %v24_v10 }
  0x14   :  { %1543 = vmatmul.msk.f32.gmra.mxu3 %vm43_vm0, %v32_v11 }
  0x19   :  { %1532 = vmatmul.msk.f32.gmra.mxu0 %vm43_vm0, %v21_v12 }
  0x1a   :  { %1536 = vmatmul.msk.f32.gmra.mxu1 %vm43_vm0, %v25_v13  ;;  %1540 = vmatmul.msk.f32.gmra.mxu2 %vm43_vm0, %v29_v14 }
  0x1c   :  { %1544 = vmatmul.msk.f32.gmra.mxu3 %vm43_vm0, %v33_v15 }
  0x21   :  { %1533 = vmatmul.msk.f32.gmra.mxu0 %vm43_vm0, %v22_v16 }
  0x22   :  { %1537 = vmatmul.msk.f32.gmra.mxu1 %vm43_vm0, %v26_v17  ;;  %1541 = vmatmul.msk.f32.gmra.mxu2 %vm43_vm0, %v30_v18 }
  0x24   :  { %1545 = vmatmul.msk.f32.gmra.mxu3 %vm43_vm0, %v34_v19 }
  0x86   :  { %v109_v22 = vpop.f32.mrf.mxu0 }
  0x87   :  { %v110_v24 = vadd.f32 %v1850_v21, %v109_v22  ;;  %v121_v25 = vpop.f32.mrf.mxu1 }
  0x88   :  { %v122_v26 = vadd.f32 %v1850_v21, %v121_v25 }
  0x89   :  { %157 = vst [vmem:[#allocation6] sm:$0xff] %v110_v24  ;;  %vm189_vm1 = vcmp.lt.s32.totalorder %v110_v24, 0  ;;  %v205_v27 = vxor.u32 2147483647, %v110_v24 }
  0x8a   :  { %161 = vst [vmem:[#allocation6 + $0x20] sm:$0xff] %v122_v26  ;;  %vm193_vm2 = vcmp.lt.s32.totalorder %v122_v26, 0  ;;  %v209_v28 = vxor.u32 2147483647, %v122_v26 }
  0x8b   :  { %v221_v30 = vsel %vm189_vm1, %v205_v27, %v110_v24 }
  0x8c   :  { %v225_v31 = vsel %vm193_vm2, %v209_v28, %v122_v26  ;;  %v239_v32 = vand.u32 4294967168, %v221_v30 }
  0x8d   :  { %v133_v33 = vpop.f32.mrf.mxu2  ;;  %v243_v34 = vand.u32 4294967168, %v225_v31 }
  0x8e   :  { %v134_v35 = vadd.f32 %v1850_v21, %v133_v33  ;;  %v112_v36 = vpop.f32.mrf.mxu0  ;;  %v1861_v37 = vor.u32 %v1857_v29, %v239_v32 }
  0x8f   :  { %v113_v38 = vadd.f32 %v1850_v21, %v112_v36  ;;  %v124_v39 = vpop.f32.mrf.mxu1  ;;  %v145_v40 = vpop.f32.mrf.mxu3  ;;  %v1865_v41 = vor.u32 %v1857_v29, %v243_v34 }
  0x90   :  { %165 = vst [vmem:[#allocation6 + $0x40] sm:$0xff] %v134_v35  ;;  %vm197_vm3 = vcmp.lt.s32.totalorder %v134_v35, 0  ;;  %v213_v42 = vxor.u32 2147483647, %v134_v35  ;;  %v125_v43 = vadd.f32 %v1850_v21, %v124_v39  ;;  %v1869_v44 = vadd.f32 %v1850_v21, %v145_v40 }
  0x91   :  { %158 = vst [vmem:[#allocation6 + $0x8] sm:$0xff] %v113_v38  ;;  %vm190_vm4 = vcmp.lt.s32.totalorder %v113_v38, 0  ;;  %v206_v45 = vxor.u32 2147483647, %v113_v38  ;;  %v329_v46 = vshra.s32 %v1865_v41, 16  ;;  %v273_v47 = vshra.s32 %v1861_v37, 16 }
  0x92   :  { %v229_v48 = vsel %vm197_vm3, %v213_v42, %v134_v35  ;;  %162 = vst [vmem:[#allocation6 + $0x28] sm:$0xff] %v125_v43  ;;  %v210_v53 = vxor.u32 2147483647, %v125_v43  ;;  %vm194_vm5 = vcmp.lt.s32.totalorder %v125_v43, 0  ;;  %v217_v33 = vxor.u32 2147483647, %v1869_v44 }
  0x93   :  { %v222_v49 = vsel %vm190_vm4, %v206_v45, %v113_v38  ;;  %169 = vst [vmem:[#allocation6 + $0x60] sm:$0xff] %v1869_v44  ;;  %v1874_v50 = vcvt.s32.f32 %v329_v46  ;;  %v1876_v51 = vcvt.s32.f32 %v273_v47  ;;  %v247_v52 = vand.u32 4294967168, %v229_v48 }
  0x94   :  { %v240_v58 = vand.u32 4294967168, %v222_v49  ;;  %v226_v1 = vsel %vm194_vm5, %v210_v53, %v125_v43  ;;  %vm201_vm12 = vcmp.lt.s32.totalorder %v1869_v44, 0 }
  0x95   :  { %v136_v54 = vpop.f32.mrf.mxu2  ;;  %332 = vmax.xlane.f32.xlu2 %v1874_v50  ;;  %276 = vmax.xlane.f32.xlu0 %v1876_v51  ;;  %v1882_v57 = vor.u32 %v1857_v29, %v247_v52  ;;  %v244_v10 = vand.u32 4294967168, %v226_v1  ;;  %v233_v52 = vsel %vm201_vm12, %v217_v33, %v1869_v44 }
  0x96   :  { %v137_v55 = vadd.f32 %v1850_v21, %v136_v54  ;;  %v115_v56 = vpop.f32.mrf.mxu0  ;;  %v1893_v6 = vor.u32 %v1857_v29, %v240_v58 }
  0x97   :  { %v116_v59 = vadd.f32 %v1850_v21, %v115_v56  ;;  %v127_v60 = vpop.f32.mrf.mxu1  ;;  %v148_v61 = vpop.f32.mrf.mxu3  ;;  %v385_v63 = vshra.s32 %v1882_v57, 16  ;;  %v1907_v26 = vor.u32 %v1857_v29, %v244_v10 }
  0x98   :  { %166 = vst [vmem:[#allocation6 + $0x48] sm:$0xff] %v137_v55  ;;  %vm198_vm6 = vcmp.lt.s32.totalorder %v137_v55, 0  ;;  %v214_v62 = vxor.u32 2147483647, %v137_v55  ;;  %v128_v0 = vadd.f32 %v1850_v21, %v127_v60  ;;  %v1888_v3 = vadd.f32 %v1850_v21, %v148_v61 }
  0x99   :  { %159 = vst [vmem:[#allocation6 + $0x10] sm:$0xff] %v116_v59  ;;  %vm191_vm7 = vcmp.lt.s32.totalorder %v116_v59, 0  ;;  %v207_v2 = vxor.u32 2147483647, %v116_v59  ;;  %v1890_v5 = vcvt.s32.f32 %v385_v63  ;;  %v287_v15 = vshra.s32 %v1893_v6, 16 }
  0x9a   :  { %v230_v4 = vsel %vm198_vm6, %v214_v62, %v137_v55  ;;  %163 = vst [vmem:[#allocation6 + $0x30] sm:$0xff] %v128_v0  ;;  %v211_v9 = vxor.u32 2147483647, %v128_v0  ;;  %vm195_vm8 = vcmp.lt.s32.totalorder %v128_v0, 0  ;;  %v343_v42 = vshra.s32 %v1907_v26, 16 }
  0x9b   :  { %v223_v7 = vsel %vm191_vm7, %v207_v2, %v116_v59  ;;  %170 = vst [vmem:[#allocation6 + $0x68] sm:$0xff] %v1888_v3  ;;  %v248_v8 = vand.u32 4294967168, %v230_v4  ;;  %388 = vmax.xlane.f32.xlu1 %v1890_v5  ;;  %v1914_v31 = vcvt.s32.f32 %v287_v15  ;;  %v251_v2 = vand.u32 4294967168, %v233_v52 }
  0x9c   :  { %v241_v13 = vand.u32 4294967168, %v223_v7  ;;  %v227_v22 = vsel %vm195_vm8, %v211_v9, %v128_v0  ;;  %v1937_v62 = vcvt.s32.f32 %v343_v42  ;;  %vm202_vm0 = vcmp.lt.s32.totalorder %v1888_v3, 0 }
  0x9d   :  { %v1898_v11 = vor.u32 %v1857_v29, %v248_v8  ;;  %v139_v12 = vpop.f32.mrf.mxu2  ;;  %v245_v45 = vand.u32 4294967168, %v227_v22 }
  0x9e   :  { %v118_v14 = vpop.f32.mrf.mxu0  ;;  %v140_v16 = vadd.f32 %v1850_v21, %v139_v12  ;;  %v1912_v30 = vor.u32 %v1857_v29, %v241_v13  ;;  %v218_v12 = vxor.u32 2147483647, %v1888_v3  ;;  %v1952_v13 = vor.u32 %v1857_v29, %v251_v2 }
  0x9f   :  { %v119_v17 = vadd.f32 %v1850_v21, %v118_v14  ;;  %v399_v18 = vshra.s32 %v1898_v11, 16  ;;  %v130_v19 = vpop.f32.mrf.mxu1  ;;  %v151_v20 = vpop.f32.mrf.mxu3  ;;  %v1934_v60 = vor.u32 %v1857_v29, %v245_v45 }
  0xa0   :  { %v131_v24 = vadd.f32 %v1850_v21, %v130_v19  ;;  %167 = vst [vmem:[#allocation6 + $0x50] sm:$0xff] %v140_v16  ;;  %v152_v25 = vadd.f32 %v1850_v21, %v151_v20  ;;  %v301_v40 = vshra.s32 %v1912_v30, 16  ;;  %vm199_vm13 = vcmp.lt.s32.totalorder %v140_v16, 0 }
  0xa1   :  { %160 = vst [vmem:[#allocation6 + $0x18] sm:$0xff] %v119_v17  ;;  %vm192_vm9 = vcmp.lt.s32.totalorder %v119_v17, 0  ;;  %v208_v27 = vxor.u32 2147483647, %v119_v17  ;;  %v1909_v28 = vcvt.s32.f32 %v399_v18  ;;  %v215_v53 = vxor.u32 2147483647, %v140_v16 }
  0xa2   :  { %164 = vst [vmem:[#allocation6 + $0x38] sm:$0xff] %v131_v24  ;;  %vm196_vm10 = vcmp.lt.s32.totalorder %v131_v24, 0  ;;  %v212_v32 = vxor.u32 2147483647, %v131_v24  ;;  %vm203_vm11 = vcmp.lt.s32.totalorder %v152_v25, 0  ;;  %v1931_v59 = vcvt.s32.f32 %v301_v40 }
  0xa3   :  { %v224_v34 = vsel %vm192_vm9, %v208_v27, %v119_v17  ;;  %402 = vmax.xlane.f32.xlu2 %v1909_v28  ;;  %171 = vst [vmem:[#allocation6 + $0x70] sm:$0xff] %v152_v25  ;;  %v219_v35 = vxor.u32 2147483647, %v152_v25  ;;  %290 = vmax.xlane.f32.xlu1 %v1914_v31  ;;  %v231_v1 = vsel %vm199_vm13, %v215_v53, %v140_v16  ;;  %v357_v8 = vshra.s32 %v1934_v60, 16 }
  0xa4   :  { %v228_v36 = vsel %vm196_vm10, %v212_v32, %v131_v24  ;;  %v242_v38 = vand.u32 4294967168, %v224_v34  ;;  %v249_v10 = vand.u32 4294967168, %v231_v1  ;;  %v234_v20 = vsel %vm202_vm0, %v218_v12, %v1888_v3 }
  0xa5   :  { %v235_v39 = vsel %vm203_vm11, %v219_v35, %v152_v25  ;;  %v142_v43 = vpop.f32.mrf.mxu2  ;;  %v246_v49 = vand.u32 4294967168, %v228_v36  ;;  %v1960_v17 = vcvt.s32.f32 %v357_v8  ;;  %v441_v22 = vshra.s32 %v1952_v13, 16 }
  0xa6   :  { %v143_v46 = vadd.f32 %v1850_v21, %v142_v43  ;;  %v1924_v47 = vor.u32 %v1857_v29, %v242_v38  ;;  %v253_v48 = vand.u32 4294967168, %v235_v39  ;;  %v1965_v19 = vor.u32 %v1857_v29, %v249_v10 }
  0xa7   :  { %v154_v54 = vpop.f32.mrf.mxu3  ;;  %v1942_v0 = vor.u32 %v1857_v29, %v246_v49  ;;  %v252_v32 = vand.u32 4294967168, %v234_v20  ;;  %v443_v33 = vcvt.s32.f32 %v441_v22  ;;  %v272_v43 = vand.u32 65535, %v1861_v37 }
  0xa8   :  { %168 = vst [vmem:[#allocation6 + $0x58] sm:$0xff] %v143_v46  ;;  %vm200_vm14 = vcmp.lt.s32.totalorder %v143_v46, 0  ;;  %v216_v55 = vxor.u32 2147483647, %v143_v46  ;;  %v315_v56 = vshra.s32 %v1924_v47, 16  ;;  %v1929_v58 = vor.u32 %v1857_v29, %v253_v48 }
  0xa9   :  { %v155_v61 = vadd.f32 %v1850_v21, %v154_v54  ;;  %v371_v9 = vshra.s32 %v1942_v0, 16  ;;  %v413_v27 = vshra.s32 %v1965_v19, 16  ;;  %v1980_v36 = vor.u32 %v1857_v29, %v252_v32 }
  0xaa   :  { %v232_v44 = vsel %vm200_vm14, %v216_v55, %v143_v46  ;;  %v1939_v63 = vcvt.s32.f32 %v315_v56  ;;  %v469_v4 = vshra.s32 %v1929_v58, 16  ;;  %v274_v45 = vcvt.s32.f32 %v272_v43 }
  0xab   :  { %304 = vmax.xlane.f32.xlu2 %v1931_v59  ;;  %172 = vst [vmem:[#allocation6 + $0x78] sm:$0xff] %v155_v61  ;;  %346 = vmax.xlane.f32.xlu1 %v1937_v62  ;;  %v220_v21 = vxor.u32 2147483647, %v155_v61  ;;  %v250_v7 = vand.u32 4294967168, %v232_v44  ;;  %vm204_vm15 = vcmp.lt.s32.totalorder %v155_v61, 0  ;;  %v1962_v18 = vcvt.s32.f32 %v371_v9 }
  0xac   :  { %318 = vmax.xlane.f32.xlu0 %v1939_v63  ;;  %v1955_v14 = vcvt.s32.f32 %v469_v4  ;;  %v1977_v3 = vcvt.s32.f32 %v413_v27  ;;  %v455_v39 = vshra.s32 %v1980_v36, 16  ;;  %v328_v49 = vand.u32 65535, %v1865_v41 }
  0xad   :  { %v236_v15 = vsel %vm204_vm15, %v220_v21, %v155_v61  ;;  %v1958_v16 = vor.u32 %v1857_v29, %v250_v7  ;;  %v286_v55 = vand.u32 65535, %v1893_v6  ;;  %v342_v1 = vand.u32 65535, %v1907_v26 }
  0xae   :  { %v254_v24 = vand.u32 4294967168, %v236_v15  ;;  %v1987_v42 = vcvt.s32.f32 %v455_v39  ;;  %v330_v53 = vcvt.s32.f32 %v328_v49  ;;  %v384_v8 = vand.u32 65535, %v1882_v57 }
  0xaf   :  { %v427_v25 = vshra.s32 %v1958_v16, 16  ;;  %v344_v21 = vcvt.s32.f32 %v342_v1  ;;  %v440_v20 = vand.u32 65535, %v1952_v13  ;;  %v398_v39 = vand.u32 65535, %v1898_v11 }
  0xb0   :  { %v1975_v34 = vor.u32 %v1857_v29, %v254_v24  ;;  %v386_v12 = vcvt.s32.f32 %v384_v8  ;;  %v468_v43 = vand.u32 65535, %v1929_v58 }
  0xb1   :  { %v429_v35 = vcvt.s32.f32 %v427_v25  ;;  %v442_v24 = vcvt.s32.f32 %v440_v20 }
  0xb2   :  { %v483_v38 = vshra.s32 %v1975_v34, 16  ;;  %v470_v49 = vcvt.s32.f32 %v468_v43  ;;  %v482_v20 = vand.u32 65535, %v1975_v34 }
  0xb3   :  { %360 = vmax.xlane.f32.xlu2 %v1960_v17  ;;  %472 = vmax.xlane.f32.xlu1 %v1955_v14 }
  0xb4   :  { %374 = vmax.xlane.f32.xlu0 %v1962_v18  ;;  %v1985_v40 = vcvt.s32.f32 %v483_v38 }
  0xbb   :  { %444 = vmax.xlane.f32.xlu2 %v443_v33  ;;  %430 = vmax.xlane.f32.xlu1 %v429_v35 }
  0xbc   :  { %416 = vmax.xlane.f32.xlu0 %v1977_v3 }
  0xc3   :  { %486 = vmax.xlane.f32.xlu2 %v1985_v40 }
  0xc4   :  { %458 = vmax.xlane.f32.xlu0 %v1987_v42 }
 0x108   :  { %v1992_v29 = vpop.xlane.xlu0 %276  ;;  %v1996_v48 = vpop.xlane.xlu2 %332 }
 0x109   :  { %vm278_vm1 = vcmp.eq.f32.partialorder %v1876_v51, %v1992_v29  ;;  %vm334_vm2 = vcmp.eq.f32.partialorder %v1874_v50, %v1996_v48  ;;  %v288_v51 = vcvt.s32.f32 %v286_v55 }
 0x10a   :  { %v279_v46 = vsel %vm278_vm1, %v274_v45, -inf  ;;  %v335_v54 = vsel %vm334_vm2, %v330_v53, -inf  ;;  %v454_v45 = vand.u32 65535, %v1980_v36 }
 0x10b   :  { %280 = vmax.xlane.f32.xlu0 %v279_v46  ;;  %v400_v46 = vcvt.s32.f32 %v398_v39 }
 0x10e   :  { %v1999_v52 = vpop.xlane.xlu1 %388 }
 0x10f   :  { %vm390_vm5 = vcmp.eq.f32.partialorder %v1890_v5, %v1999_v52 }
 0x110   :  { %v391_v15 = vsel %vm390_vm5, %v386_v12, -inf }
 0x113   :  { %336 = vmax.xlane.f32.xlu0 %v335_v54 }
 0x116   :  { %v2004_v56 = vpop.xlane.xlu2 %402  ;;  %v2006_v61 = vpop.xlane.xlu1 %290 }
 0x117   :  { %vm292_vm3 = vcmp.eq.f32.partialorder %v1914_v31, %v2006_v61  ;;  %vm404_vm8 = vcmp.eq.f32.partialorder %v1909_v28, %v2004_v56  ;;  %v300_v28 = vand.u32 65535, %v1912_v30 }
 0x118   :  { %v293_v44 = vsel %vm292_vm3, %v288_v51, -inf  ;;  %v405_v53 = vsel %vm404_vm8, %v400_v46, -inf  ;;  %v356_v51 = vand.u32 65535, %v1934_v60  ;;  %v339_v46 = vcvt.f32.s32 %v1996_v48 }
 0x119   :  { %294 = vmax.xlane.f32.xlu1 %v293_v44  ;;  %v302_v44 = vcvt.s32.f32 %v300_v28 }
 0x11e   :  { %v2011_v2 = vpop.xlane.xlu2 %304  ;;  %v2013_v50 = vpop.xlane.xlu1 %346 }
 0x11f   :  { %v2015_v4 = vpop.xlane.xlu0 %318  ;;  %vm348_vm4 = vcmp.eq.f32.partialorder %v1937_v62, %v2013_v50  ;;  %v426_v62 = vand.u32 65535, %v1958_v16  ;;  %vm306_vm12 = vcmp.eq.f32.partialorder %v1931_v59, %v2011_v2 }
 0x120   :  { %v349_v7 = vsel %vm348_vm4, %v344_v21, -inf  ;;  %v314_v21 = vand.u32 65535, %v1924_v47  ;;  %vm320_vm13 = vcmp.eq.f32.partialorder %v1939_v63, %v2015_v4 }
 0x121   :  { %350 = vmax.xlane.f32.xlu0 %v349_v7  ;;  %v428_v5 = vcvt.s32.f32 %v426_v62  ;;  %v412_v7 = vand.u32 65535, %v1965_v19  ;;  %v370_v62 = vand.u32 65535, %v1942_v0 }
 0x122   :  { %v316_v8 = vcvt.s32.f32 %v314_v21 }
 0x123   :  { %v372_v63 = vcvt.s32.f32 %v370_v62 }
 0x124   :  { %v321_v12 = vsel %vm320_vm13, %v316_v8, -inf }
 0x126   :  { %v2020_v9 = vpop.xlane.xlu2 %360  ;;  %v2024_v31 = vpop.xlane.xlu1 %472 }
 0x127   :  { %v2026_v10 = vpop.xlane.xlu0 %374  ;;  %vm474_vm9 = vcmp.eq.f32.partialorder %v1955_v14, %v2024_v31  ;;  %vm362_vm11 = vcmp.eq.f32.partialorder %v1960_v17, %v2020_v9  ;;  %v358_v14 = vcvt.s32.f32 %v356_v51  ;;  %v414_v17 = vcvt.s32.f32 %v412_v7 }
 0x128   :  { %v475_v54 = vsel %vm474_vm9, %v470_v49, -inf  ;;  %vm376_vm0 = vcmp.eq.f32.partialorder %v1962_v18, %v2026_v10  ;;  %v340_v18 = vshll.u32 %v339_v46, 16  ;;  %v297_v51 = vcvt.f32.s32 %v2006_v61 }
 0x129   :  { %392 = vmax.xlane.f32.xlu0 %v391_v15  ;;  %v363_v1 = vsel %vm362_vm11, %v358_v14, -inf  ;;  %v353_v7 = vcvt.f32.s32 %v2013_v50 }
 0x12e   :  { %v2030_v22 = vpop.xlane.xlu2 %444  ;;  %v2032_v25 = vpop.xlane.xlu1 %430 }
 0x12f   :  { %v2034_v27 = vpop.xlane.xlu0 %416  ;;  %vm446_vm6 = vcmp.eq.f32.partialorder %v443_v33, %v2030_v22  ;;  %vm432_vm7 = vcmp.eq.f32.partialorder %v429_v35, %v2032_v25  ;;  %v456_v35 = vcvt.s32.f32 %v454_v45  ;;  %v451_v46 = vcvt.f32.s32 %v2030_v22 }
 0x130   :  { %v447_v32 = vsel %vm446_vm6, %v442_v24, -inf  ;;  %v433_v38 = vsel %vm432_vm7, %v428_v5, -inf  ;;  %vm418_vm14 = vcmp.eq.f32.partialorder %v1977_v3, %v2034_v27  ;;  %v484_v24 = vcvt.s32.f32 %v482_v20 }
 0x131   :  { %448 = vmax.xlane.f32.xlu1 %v447_v32  ;;  %434 = vmax.xlane.f32.xlu0 %v433_v38  ;;  %v419_v59 = vsel %vm418_vm14, %v414_v17, -inf  ;;  %v377_v5 = vsel %vm376_vm0, %v372_v63, -inf  ;;  %v283_v32 = vcvt.f32.s32 %v1992_v29  ;;  %v354_v20 = vshll.u32 %v353_v7, 16 }
 0x132   :  { %v367_v22 = vcvt.f32.s32 %v2020_v9 }
 0x133   :  { %v284_v39 = vshll.u32 %v283_v32, 16 }
 0x136   :  { %v2061_v15 = vpop.xlane.xlu2 %486 }
 0x137   :  { %v2045_v33 = vpop.xlane.xlu0 %458  ;;  %vm488_vm15 = vcmp.eq.f32.partialorder %v1985_v40, %v2061_v15 }
 0x138   :  { %vm460_vm10 = vcmp.eq.f32.partialorder %v1987_v42, %v2045_v33  ;;  %v307_v42 = vsel %vm306_vm12, %v302_v44, -inf  ;;  %v489_v3 = vsel %vm488_vm15, %v484_v24, -inf }
 0x139   :  { %406 = vmax.xlane.f32.xlu1 %v405_v53  ;;  %v461_v55 = vsel %vm460_vm10, %v456_v35, -inf  ;;  %476 = vmax.xlane.f32.xlu0 %v475_v54 }
 0x13a   :  { %462 = vmax.xlane.f32.xlu2 %v461_v55 }
 0x141   :  { %364 = vmax.xlane.f32.xlu1 %v363_v1  ;;  %v298_v1 = vshll.u32 %v297_v51, 16 }
 0x142   :  { %308 = vmax.xlane.f32.xlu2 %v307_v42 }
 0x149   :  { %322 = vmax.xlane.f32.xlu1 %v321_v12 }
 0x14a   :  { %420 = vmax.xlane.f32.xlu2 %v419_v59 }
 0x151   :  { %490 = vmax.xlane.f32.xlu1 %v489_v3 }
 0x152   :  { %378 = vmax.xlane.f32.xlu2 %v377_v5 }
 0x17e   :  { %v281_v38 = vpop.xlane.xlu0 %280 }
 0x17f   :  { %v282_v43 = vcvt.f32.s32 %v281_v38 }
 0x181   :  { %v2070_v45 = vadd.s32 %v284_v39, %v282_v43  ;;  %v409_v43 = vcvt.f32.s32 %v2004_v56  ;;  %v395_v56 = vcvt.f32.s32 %v1999_v52 }
 0x183   :  { %v496_v40 = vand.u32 127, %v2070_v45 }
 0x185   :  { %v2074_v49 = vsub.s32 127, %v496_v40  ;;  %v465_v40 = vcvt.f32.s32 %v2045_v33 }
 0x186   :  { %v337_v35 = vpop.xlane.xlu0 %336 }
 0x187   :  { %v338_v53 = vcvt.f32.s32 %v337_v35  ;;  %vm608_vm1 = vcmp.eq.s32.totalorder %v1852_v23, %v2074_v49 }
 0x188   :  { %v2079_v54 = vsel %vm608_vm1, 2147483648, %v1861_v37 }
 0x189   :  { %v2081_v29 = vadd.s32 %v340_v18, %v338_v53  ;;  %v641_v55 = vshra.s32 %v2079_v54, 16  ;;  %v410_v53 = vshll.u32 %v409_v43, 16 }
 0x18b   :  { %v500_v48 = vand.u32 127, %v2081_v29  ;;  %v2086_v28 = vcvt.s32.f32 %v641_v55  ;;  %v452_v55 = vshll.u32 %v451_v46, 16 }
 0x18c   :  { %v295_v44 = vpop.xlane.xlu1 %294 }
 0x18d   :  { %v2088_v14 = vsub.s32 127, %v500_v48  ;;  %644 = vmax.xlane.f32.xlu2 %v2086_v28  ;;  %v296_v42 = vcvt.f32.s32 %v295_v44  ;;  %v466_v48 = vshll.u32 %v465_v40, 16 }
 0x18f   :  { %vm612_vm2 = vcmp.eq.s32.totalorder %v1852_v23, %v2088_v14  ;;  %v2093_v37 = vadd.s32 %v298_v1, %v296_v42 }
 0x190   :  { %v2096_v21 = vsel %vm612_vm2, 2147483648, %v1865_v41 }
 0x191   :  { %v697_v61 = vshra.s32 %v2096_v21, 16  ;;  %v497_v8 = vand.u32 127, %v2093_v37 }
 0x193   :  { %v2101_v17 = vcvt.s32.f32 %v697_v61  ;;  %v2103_v12 = vsub.s32 127, %v497_v8  ;;  %v311_v8 = vcvt.f32.s32 %v2011_v2 }
 0x194   :  { %v351_v59 = vpop.xlane.xlu0 %350 }
 0x195   :  { %700 = vmax.xlane.f32.xlu1 %v2101_v17  ;;  %v352_v62 = vcvt.f32.s32 %v351_v59  ;;  %vm609_vm3 = vcmp.eq.s32.totalorder %v1852_v23, %v2103_v12  ;;  %v312_v52 = vshll.u32 %v311_v8, 16 }
 0x196   :  { %v2109_v41 = vsel %vm609_vm3, 2147483648, %v1893_v6 }
 0x197   :  { %v2111_v24 = vadd.s32 %v354_v20, %v352_v62  ;;  %v655_v50 = vshra.s32 %v2109_v41, 16 }
 0x199   :  { %v501_v63 = vand.u32 127, %v2111_v24  ;;  %v2115_v3 = vcvt.s32.f32 %v655_v50 }
 0x19b   :  { %v2117_v5 = vsub.s32 127, %v501_v63 }
 0x19c   :  { %v393_v61 = vpop.xlane.xlu0 %392 }
 0x19d   :  { %658 = vmax.xlane.f32.xlu1 %v2115_v3  ;;  %vm613_vm4 = vcmp.eq.s32.totalorder %v1852_v23, %v2117_v5  ;;  %v394_v50 = vcvt.f32.s32 %v393_v61  ;;  %v423_v61 = vcvt.f32.s32 %v2034_v27 }
 0x19e   :  { %v2123_v32 = vsel %vm613_vm4, 2147483648, %v1907_v26 }
 0x19f   :  { %v711_v6 = vshra.s32 %v2123_v32, 16 }
 0x1a1   :  { %v2126_v38 = vcvt.s32.f32 %v711_v6  ;;  %v396_v6 = vshll.u32 %v395_v56, 16 }
 0x1a3   :  { %714 = vmax.xlane.f32.xlu0 %v2126_v38 }
 0x1a4   :  { %v449_v39 = vpop.xlane.xlu1 %448 }
 0x1a5   :  { %v450_v35 = vcvt.f32.s32 %v449_v39  ;;  %v368_v39 = vshll.u32 %v367_v22, 16 }
 0x1a7   :  { %v2132_v1 = vadd.s32 %v452_v55, %v450_v35 }
 0x1a9   :  { %v508_v20 = vand.u32 127, %v2132_v1 }
 0x1ab   :  { %v2153_v35 = vsub.s32 127, %v508_v20 }
 0x1ac   :  { %v407_v18 = vpop.xlane.xlu1 %406 }
 0x1ad   :  { %v408_v51 = vcvt.f32.s32 %v407_v18  ;;  %v463_v26 = vpop.xlane.xlu2 %462  ;;  %2925 = vst [vmem:[#allocation11_spill] sm:$0xff] %v2153_v35  ;;  %vm620_vm7 = vcmp.eq.s32.totalorder %v1852_v23, %v2153_v35 }
 0x1ae   :  { %v464_v44 = vcvt.f32.s32 %v463_v26  ;;  %v325_v26 = vcvt.f32.s32 %v2015_v4 }
 0x1af   :  { %v2134_v42 = vadd.s32 %v410_v53, %v408_v51  ;;  %v2157_v53 = vadd.s32 %v396_v6, %v394_v50  ;;  %v2181_v6 = vsel %vm620_vm7, 2147483648, %v1952_v13 }
 0x1b0   :  { %v2136_v7 = vadd.s32 %v466_v48, %v464_v44  ;;  %v435_v48 = vpop.xlane.xlu0 %434 }
 0x1b1   :  { %v505_v33 = vand.u32 127, %v2134_v42  ;;  %v504_v22 = vand.u32 127, %v2157_v53  ;;  %v436_v8 = vcvt.f32.s32 %v435_v48  ;;  %v809_v48 = vshra.s32 %v2181_v6, 16 }
 0x1b2   :  { %v509_v59 = vand.u32 127, %v2136_v7 }
 0x1b3   :  { %v2144_v62 = vsub.s32 127, %v505_v33 }
 0x1b4   :  { %v365_v63 = vpop.xlane.xlu1 %364  ;;  %v2148_v9 = vsub.s32 127, %v509_v59 }
 0x1b5   :  { %2923 = vst [vmem:[#allocation9_spill] sm:$0xff] %v2144_v62  ;;  %v366_v43 = vcvt.f32.s32 %v365_v63  ;;  %v309_v46 = vpop.xlane.xlu2 %308  ;;  %vm617_vm5 = vcmp.eq.s32.totalorder %v1852_v23, %v2144_v62  ;;  %v326_v63 = vshll.u32 %v325_v26, 16 }
 0x1b6   :  { %2924 = vst [vmem:[#allocation10_spill] sm:$0xff] %v2148_v9  ;;  %v310_v40 = vcvt.f32.s32 %v309_v46  ;;  %v2151_v2 = vsel %vm617_vm5, 2147483648, %v1898_v11  ;;  %vm621_vm6 = vcmp.eq.s32.totalorder %v1852_v23, %v2148_v9  ;;  %v437_v11 = vcvt.f32.s32 %v2032_v25 }
 0x1b7   :  { %v2155_v18 = vadd.s32 %v368_v39, %v366_v43  ;;  %v767_v51 = vshra.s32 %v2151_v2, 16  ;;  %v2177_v50 = vsel %vm621_vm6, 2147483648, %v1980_v36  ;;  %v424_v43 = vshll.u32 %v423_v61, 16 }
 0x1b8   :  { %v2159_v55 = vadd.s32 %v312_v52, %v310_v40  ;;  %v823_v27 = vshra.s32 %v2177_v50, 16  ;;  %v438_v39 = vshll.u32 %v437_v11, 16  ;;  %v2186_v40 = vsub.s32 127, %v504_v22 }
 0x1b9   :  { %v502_v56 = vand.u32 127, %v2155_v18  ;;  %v2174_v59 = vcvt.s32.f32 %v767_v51  ;;  %v381_v11 = vcvt.f32.s32 %v2026_v10 }
 0x1ba   :  { %v498_v44 = vand.u32 127, %v2159_v55  ;;  %2926 = vst [vmem:[#allocation12_spill] sm:$0xff] %v2186_v40  ;;  %v2188_v51 = vcvt.s32.f32 %v823_v27  ;;  %v2192_v36 = vadd.s32 %v438_v39, %v436_v8  ;;  %v2210_v8 = vcvt.s32.f32 %v809_v48 }
 0x1bb   :  { %v2183_v46 = vsub.s32 127, %v502_v56  ;;  %770 = vmax.xlane.f32.xlu1 %v2174_v59  ;;  %vm616_vm10 = vcmp.eq.s32.totalorder %v1852_v23, %v2186_v40  ;;  %v477_v40 = vpop.xlane.xlu0 %476 }
 0x1bc   :  { %v2172_v33 = vsub.s32 127, %v498_v44  ;;  %v323_v4 = vpop.xlane.xlu1 %322  ;;  %2927 = vst [vmem:[#allocation13_spill] sm:$0xff] %v2192_v36  ;;  %826 = vmax.xlane.f32.xlu2 %v2188_v51  ;;  %v507_v22 = vand.u32 127, %v2192_v36  ;;  %v2225_v39 = vsel %vm616_vm10, 2147483648, %v1882_v57  ;;  %v696_v36 = vand.u32 65535, %v2096_v21 }
 0x1bd   :  { %v324_v20 = vcvt.f32.s32 %v323_v4  ;;  %v421_v25 = vpop.xlane.xlu2 %420  ;;  %vm614_vm9 = vcmp.eq.s32.totalorder %v1852_v23, %v2183_v46  ;;  %v710_v21 = vand.u32 65535, %v2123_v32 }
 0x1be   :  { %v422_v52 = vcvt.f32.s32 %v421_v25  ;;  %vm610_vm8 = vcmp.eq.s32.totalorder %v1852_v23, %v2172_v33  ;;  %v2217_v10 = vsel %vm614_vm9, 2147483648, %v1934_v60  ;;  %v382_v25 = vshll.u32 %v381_v11, 16 }
 0x1bf   :  { %v2194_v26 = vadd.s32 %v326_v63, %v324_v20  ;;  %v2201_v44 = vsel %vm610_vm8, 2147483648, %v1912_v30  ;;  %v725_v48 = vshra.s32 %v2217_v10, 16  ;;  %v698_v62 = vcvt.s32.f32 %v696_v36 }
 0x1c0   :  { %v2196_v13 = vadd.s32 %v424_v43, %v422_v52  ;;  %v669_v56 = vshra.s32 %v2201_v44, 16  ;;  %v2227_v43 = vsub.s32 127, %v507_v22  ;;  %v712_v36 = vcvt.s32.f32 %v710_v21 }
 0x1c1   :  { %v499_v4 = vand.u32 127, %v2194_v26  ;;  %v668_v32 = vand.u32 65535, %v2201_v44 }
 0x1c2   :  { %v506_v61 = vand.u32 127, %v2196_v13  ;;  %v2220_v63 = vcvt.s32.f32 %v669_v56  ;;  %2929 = vst [vmem:[#allocation15_spill] sm:$0xff] %v2227_v43  ;;  %vm619_vm13 = vcmp.eq.s32.totalorder %v1852_v23, %v2227_v43  ;;  %v640_v43 = vand.u32 65535, %v2079_v54 }
 0x1c3   :  { %812 = vmax.xlane.f32.xlu1 %v2210_v8  ;;  %v2229_v52 = vsub.s32 127, %v499_v4  ;;  %v654_v54 = vand.u32 65535, %v2109_v41  ;;  %v493_v41 = vcvt.f32.s32 %v2061_v15  ;;  %v670_v15 = vcvt.s32.f32 %v668_v32 }
 0x1c4   :  { %v2214_v30 = vsub.s32 127, %v506_v61  ;;  %672 = vmax.xlane.f32.xlu0 %v2220_v63  ;;  %v753_v61 = vshra.s32 %v2225_v39, 16  ;;  %v491_v35 = vpop.xlane.xlu1 %490 }
 0x1c5   :  { %v379_v20 = vpop.xlane.xlu2 %378  ;;  %vm611_vm12 = vcmp.eq.s32.totalorder %v1852_v23, %v2229_v52 }
 0x1c6   :  { %2928 = vst [vmem:[#allocation14_spill] sm:$0xff] %v2214_v30  ;;  %v380_v27 = vcvt.f32.s32 %v379_v20  ;;  %vm618_vm11 = vcmp.eq.s32.totalorder %v1852_v23, %v2214_v30  ;;  %v2241_v20 = vcvt.s32.f32 %v725_v48  ;;  %v2253_v4 = vsel %vm611_vm12, 2147483648, %v1924_v47 }
 0x1c7   :  { %v2236_v11 = vsel %vm618_vm11, 2147483648, %v1965_v19  ;;  %v2250_v19 = vcvt.s32.f32 %v753_v61  ;;  %v683_v48 = vshra.s32 %v2253_v4, 16 }
 0x1c8   :  { %v2232_v60 = vadd.s32 %v382_v25, %v380_v27  ;;  %v781_v56 = vshra.s32 %v2236_v11, 16  ;;  %v2256_v25 = vsel %vm619_vm13, 2147483648, %v1958_v16 }
 0x1c9   :  { %v795_v9 = vshra.s32 %v2256_v25, 16  ;;  %v2266_v61 = vcvt.s32.f32 %v683_v48 }
 0x1ca   :  { %v503_v57 = vand.u32 127, %v2232_v60  ;;  %v2248_v22 = vcvt.s32.f32 %v781_v56 }
 0x1cb   :  { %728 = vmax.xlane.f32.xlu1 %v2241_v20  ;;  %v2268_v47 = vcvt.s32.f32 %v795_v9  ;;  %v642_v9 = vcvt.s32.f32 %v640_v43  ;;  %v656_v43 = vcvt.s32.f32 %v654_v54 }
 0x1cc   :  { %v2258_v27 = vsub.s32 127, %v503_v57  ;;  %784 = vmax.xlane.f32.xlu2 %v2248_v22  ;;  %756 = vmax.xlane.f32.xlu0 %v2250_v19 }
 0x1ce   :  { %2930 = vst [vmem:[#allocation16_spill] sm:$0xff] %v2258_v27  ;;  %vm615_vm14 = vcmp.eq.s32.totalorder %v1852_v23, %v2258_v27 }
 0x1cf   :  { %v2271_v16 = vsel %vm615_vm14, 2147483648, %v1942_v0 }
 0x1d0   :  { %v739_v56 = vshra.s32 %v2271_v16, 16 }
 0x1d2   :  { %v2276_v57 = vcvt.s32.f32 %v739_v56 }
 0x1d4   :  { %686 = vmax.xlane.f32.xlu2 %v2266_v61  ;;  %798 = vmax.xlane.f32.xlu0 %v2268_v47 }
 0x1dc   :  { %742 = vmax.xlane.f32.xlu2 %v2276_v57 }
 0x200   :  { %v2280_v48 = vpop.xlane.xlu2 %644 }
 0x201   :  { %vm646_vm15 = vcmp.eq.f32.partialorder %v2086_v28, %v2280_v48 }
 0x202   :  { %v647_v0 = vsel %vm646_vm15, %v642_v9, -inf }
 0x203   :  { %648 = vmax.xlane.f32.xlu0 %v647_v0  ;;  %v494_v0 = vshll.u32 %v493_v41, 16 }
 0x208   :  { %v2285_v30 = vpop.xlane.xlu1 %700 }
 0x209   :  { %vm702_vm0 = vcmp.eq.f32.partialorder %v2101_v17, %v2285_v30 }
 0x20a   :  { %v703_v56 = vsel %vm702_vm0, %v698_v62, -inf  ;;  %v492_v62 = vcvt.f32.s32 %v491_v35 }
 0x20b   :  { %704 = vmax.xlane.f32.xlu2 %v703_v56 }
 0x20c   :  { %v2300_v56 = vadd.s32 %v494_v0, %v492_v62 }
 0x210   :  { %v2290_v27 = vpop.xlane.xlu1 %658 }
 0x211   :  { %vm660_vm1 = vcmp.eq.f32.partialorder %v2115_v3, %v2290_v27  ;;  %v511_v3 = vand.u32 127, %v2300_v56 }
 0x212   :  { %v661_v28 = vsel %vm660_vm1, %v656_v43, -inf  ;;  %v479_v43 = vcvt.f32.s32 %v2024_v31  ;;  %v752_v31 = vand.u32 65535, %v2225_v39  ;;  %v682_v39 = vand.u32 65535, %v2253_v4 }
 0x213   :  { %662 = vmax.xlane.f32.xlu2 %v661_v28  ;;  %v2303_v54 = vsub.s32 127, %v511_v3  ;;  %v478_v28 = vcvt.f32.s32 %v477_v40 }
 0x214   :  { %v480_v35 = vshll.u32 %v479_v43, 16 }
 0x215   :  { %vm623_vm3 = vcmp.eq.s32.totalorder %v1852_v23, %v2303_v54 }
 0x216   :  { %v2295_v9 = vpop.xlane.xlu0 %714  ;;  %v2318_v44 = vadd.s32 %v480_v35, %v478_v28  ;;  %v780_v28 = vand.u32 65535, %v2236_v11  ;;  %v684_v35 = vcvt.s32.f32 %v682_v39 }
 0x217   :  { %vm716_vm2 = vcmp.eq.f32.partialorder %v2126_v38, %v2295_v9 }
 0x218   :  { %v717_v17 = vsel %vm716_vm2, %v712_v36, -inf  ;;  %v510_v41 = vand.u32 127, %v2318_v44 }
 0x21a   :  { %v2333_v43 = vsub.s32 127, %v510_v41 }
 0x21b   :  { %718 = vmax.xlane.f32.xlu2 %v717_v17  ;;  %v2316_v17 = vsel %vm623_vm3, 2147483648, %v1975_v34  ;;  %vm1184_vm3 = vcmask 7168  }
 0x21c   :  { %v851_v40 = vshra.s32 %v2316_v17, 16  ;;  %vm622_vm7 = vcmp.eq.s32.totalorder %v1852_v23, %v2333_v43  ;;  %v822_v23 = vand.u32 65535, %v2177_v50 }
 0x21e   :  { %v2329_v32 = vcvt.s32.f32 %v851_v40 }
 0x22e   :  { %v2323_v62 = vpop.xlane.xlu1 %770 }
 0x22f   :  { %v2309_v38 = vpop.xlane.xlu2 %826  ;;  %vm772_vm13 = vcmp.eq.f32.partialorder %v2174_v59, %v2323_v62 }
 0x230   :  { %vm828_vm10 = vcmp.eq.f32.partialorder %v2188_v51, %v2309_v38 }
 0x237   :  { %v2311_v21 = vpop.xlane.xlu0 %672 }
 0x238   :  { %vm674_vm4 = vcmp.eq.f32.partialorder %v2220_v63, %v2311_v21  ;;  %v754_v63 = vcvt.s32.f32 %v752_v31  ;;  %v2347_v31 = vpop.xlane.xlu1 %812 }
 0x239   :  { %v675_v36 = vsel %vm674_vm4, %v670_v15, -inf  ;;  %vm814_vm14 = vcmp.eq.f32.partialorder %v2210_v8, %v2347_v31 }
 0x23a   :  { %676 = vmax.xlane.f32.xlu1 %v675_v36  ;;  %v794_v36 = vand.u32 65535, %v2256_v25 }
 0x23c   :  { %v796_v41 = vcvt.s32.f32 %v794_v36 }
 0x23f   :  { %v2325_v0 = vpop.xlane.xlu2 %784  ;;  %v2327_v3 = vpop.xlane.xlu0 %756 }
 0x240   :  { %vm758_vm5 = vcmp.eq.f32.partialorder %v2250_v19, %v2327_v3  ;;  %vm786_vm6 = vcmp.eq.f32.partialorder %v2248_v22, %v2325_v0  ;;  %v782_v19 = vcvt.s32.f32 %v780_v28  ;;  %v2352_v22 = vsel %vm622_vm7, 2147483648, %v1929_v58  ;;  %v2365_v39 = vpop.xlane.xlu1 %728 }
 0x241   :  { %v759_v34 = vsel %vm758_vm5, %v754_v63, -inf  ;;  %v837_v63 = vshra.s32 %v2352_v22, 16  ;;  %v724_v28 = vand.u32 65535, %v2217_v10  ;;  %vm730_vm11 = vcmp.eq.f32.partialorder %v2241_v20, %v2365_v39 }
 0x242   :  { %854 = vmax.xlane.f32.xlu1 %v2329_v32  ;;  %760 = vmax.xlane.f32.xlu2 %v759_v34  ;;  %v787_v40 = vsel %vm786_vm6, %v782_v19, -inf  ;;  %vm1201_vm5 = vcmask 15360   ;;  %vm1218_vm6 = vcmask 23552  }
 0x243   :  { %v2362_v34 = vcvt.s32.f32 %v837_v63  ;;  %v726_v51 = vcvt.s32.f32 %v724_v28 }
 0x245   :  { %v731_v19 = vsel %vm730_vm11, %v726_v51, -inf  ;;  %vm1269_vm11 = vcmask 48128  }
 0x247   :  { %v2342_v15 = vpop.xlane.xlu2 %686  ;;  %v2349_v4 = vpop.xlane.xlu0 %798 }
 0x248   :  { %vm688_vm8 = vcmp.eq.f32.partialorder %v2266_v61, %v2342_v15  ;;  %vm800_vm9 = vcmp.eq.f32.partialorder %v2268_v47, %v2349_v4  ;;  %v824_v61 = vcvt.s32.f32 %v822_v23  ;;  %v738_v47 = vand.u32 65535, %v2271_v16 }
 0x249   :  { %v689_v11 = vsel %vm688_vm8, %v684_v35, -inf  ;;  %v2358_v25 = vsel %vm800_vm9, %v796_v41, -inf  ;;  %v808_v16 = vand.u32 65535, %v2181_v6  ;;  %v651_v23 = vcvt.f32.s32 %v2280_v48 }
 0x24a   :  { %690 = vmax.xlane.f32.xlu0 %v689_v11  ;;  %788 = vmax.xlane.f32.xlu1 %v787_v40  ;;  %v829_v58 = vsel %vm828_vm10, %v824_v61, -inf  ;;  %v740_v35 = vcvt.s32.f32 %v738_v47  ;;  %v766_v11 = vand.u32 65535, %v2151_v2  ;;  %v532_v41 = vand.u32 4294967168, %v2081_v29 }
 0x24b   :  { %v810_v20 = vcvt.s32.f32 %v808_v16  ;;  %v528_v2 = vand.u32 4294967168, %v2070_v45  ;;  %v652_v61 = vshll.u32 %v651_v23, 16  ;;  %v707_v6 = vcvt.f32.s32 %v2285_v30 }
 0x24c   :  { %v768_v10 = vcvt.s32.f32 %v766_v11  ;;  %v564_v28 = vxor.u32 2147483647, %v532_v41  ;;  %vm548_vm15 = vcmp.lt.s32.totalorder %v532_v41, 0  ;;  %v529_v48 = vand.u32 4294967168, %v2093_v37 }
 0x24d   :  { %v560_v47 = vxor.u32 2147483647, %v528_v2  ;;  %vm544_vm0 = vcmp.lt.s32.totalorder %v528_v2, 0  ;;  %v708_v11 = vshll.u32 %v707_v6, 16  ;;  %v665_v30 = vcvt.f32.s32 %v2290_v27 }
 0x24e   :  { %v773_v40 = vsel %vm772_vm13, %v768_v10, -inf  ;;  %vm545_vm2 = vcmp.lt.s32.totalorder %v529_v48, 0  ;;  %vm1235_vm8 = vcmask 31744   ;;  %vm1252_vm10 = vcmask 39936  }
 0x24f   :  { %v2367_v50 = vpop.xlane.xlu2 %742  ;;  %vm1286_vm13 = vcmask 56320  }
 0x250   :  { %vm744_vm12 = vcmp.eq.f32.partialorder %v2276_v57, %v2367_v50  ;;  %v815_v57 = vsel %vm814_vm14, %v810_v20, -inf }
 0x251   :  { %v745_v36 = vsel %vm744_vm12, %v740_v35, -inf  ;;  %v580_v35 = vsel %vm548_vm15, %v564_v28, %v532_v41 }
 0x252   :  { %840 = vmax.xlane.f32.xlu0 %v2362_v34  ;;  %830 = vmax.xlane.f32.xlu1 %v829_v58  ;;  %v980_v16 = vsub.f32 %v580_v35, %v580_v35 }
 0x254   :  { %v1000_v37 = vmul.f32 1.442695, %v980_v16 }
 0x256   :  { %1564 = vpow2.f32 %v1000_v37 }
 0x25a   :  { %732 = vmax.xlane.f32.xlu0 %v731_v19  ;;  %746 = vmax.xlane.f32.xlu1 %v745_v36  ;;  %v576_v36 = vsel %vm544_vm0, %v560_v47, %v528_v2  ;;  %v666_v47 = vshll.u32 %v665_v30, 16 }
 0x25b   :  { %v976_v41 = vsub.f32 %v576_v36, %v576_v36 }
 0x25d   :  { %v992_v27 = vmul.f32 1.442695, %v976_v41  ;;  %v2396_v41 = vpop.eup %1564 }
 0x262   :  { %774 = vmax.xlane.f32.xlu0 %v773_v40 }
 0x26a   :  { %816 = vmax.xlane.f32.xlu0 %v815_v57  ;;  %v561_v57 = vxor.u32 2147483647, %v529_v48 }
 0x26c   :  { %v577_v2 = vsel %vm545_vm2, %v561_v57, %v529_v48 }
 0x276   :  { %v649_v63 = vpop.xlane.xlu0 %648 }
 0x277   :  { %v650_v59 = vcvt.f32.s32 %v649_v63 }
 0x279   :  { %v653_v58 = vadd.s32 %v652_v61, %v650_v59  ;;  %v533_v59 = vand.u32 4294967168, %v2111_v24  ;;  %v721_v24 = vcvt.f32.s32 %v2295_v9 }
 0x27b   :  { %v896_v51 = vand.u32 4294967168, %v653_v58  ;;  %v864_v19 = vand.u32 127, %v653_v58  ;;  %v565_v48 = vxor.u32 2147483647, %v533_v59  ;;  %vm549_vm7 = vcmp.lt.s32.totalorder %v533_v59, 0 }
 0x27c   :  { %v722_v30 = vshll.u32 %v721_v24, 16 }
 0x27d   :  { %vm912_vm1 = vcmp.lt.s32.totalorder %v896_v51, 0  ;;  %v928_v8 = vxor.u32 2147483647, %v896_v51  ;;  %v880_v23 = vsub.s32 127, %v864_v19 }
 0x27e   :  { %v705_v29 = vpop.xlane.xlu2 %704 }
 0x27f   :  { %v944_v45 = vsel %vm912_vm1, %v928_v8, %v896_v51  ;;  %v706_v10 = vcvt.f32.s32 %v705_v29  ;;  %v1185_v28 = vsel %vm1184_vm3, %v2074_v49, %v880_v23  ;;  %v581_v23 = vsel %vm549_vm7, %v565_v48, %v533_v59 }
 0x280   :  { %v1024_v40 = vsub.f32 %v944_v45, %v576_v36  ;;  %v1202_v36 = vsel %vm1201_vm5, %v1185_v28, 0  ;;  %v981_v59 = vsub.f32 %v581_v23, %v581_v23 }
 0x281   :  { %v2386_v20 = vadd.s32 %v708_v11, %v706_v10  ;;  %v977_v11 = vsub.f32 %v577_v2, %v577_v2 }
 0x282   :  { %v1040_v6 = vmul.f32 1.442695, %v1024_v40  ;;  %v1219_v40 = vsel %vm1218_vm6, %v1202_v36, 0 }
 0x283   :  { %v900_v63 = vand.u32 4294967168, %v2386_v20  ;;  %v994_v57 = vmul.f32 1.442695, %v977_v11 }
 0x284   :  { %1566 = vpow2.f32 %v1040_v6 }
 0x285   :  { %vm916_vm4 = vcmp.lt.s32.totalorder %v900_v63, 0  ;;  %v932_v61 = vxor.u32 2147483647, %v900_v63 }
 0x286   :  { %v663_v58 = vpop.xlane.xlu2 %662 }
 0x287   :  { %v948_v51 = vsel %vm916_vm4, %v932_v61, %v900_v63  ;;  %v664_v8 = vcvt.f32.s32 %v663_v58  ;;  %v1236_v61 = vsel %vm1235_vm8, %v1219_v40, 0 }
 0x288   :  { %v1028_v19 = vsub.f32 %v948_v51, %v580_v35 }
 0x289   :  { %v667_v29 = vadd.s32 %v666_v47, %v664_v8 }
 0x28a   :  { %v1048_v45 = vmul.f32 1.442695, %v1028_v19  ;;  %v1567_v47 = vpop.eup %1566  ;;  %v1253_v19 = vsel %vm1252_vm10, %v1236_v61, 0 }
 0x28b   :  { %v865_v49 = vand.u32 127, %v667_v29  ;;  %v897_v10 = vand.u32 4294967168, %v667_v29  ;;  %v1270_v24 = vsel %vm1269_vm11, %v1253_v19, 0 }
 0x28c   :  { %1568 = vpow2.f32 %v1048_v45  ;;  %v1002_v45 = vmul.f32 1.442695, %v981_v59 }
 0x28d   :  { %1570 = vpow2.f32 %v992_v27  ;;  %v881_v35 = vsub.s32 127, %v865_v49  ;;  %vm913_vm9 = vcmp.lt.s32.totalorder %v897_v10, 0  ;;  %v929_v16 = vxor.u32 2147483647, %v897_v10 }
 0x28e   :  { %v719_v63 = vpop.xlane.xlu2 %718  ;;  %1572 = vpow2.f32 %v994_v57 }
 0x28f   :  { %v945_v9 = vsel %vm913_vm9, %v929_v16, %v897_v10  ;;  %v720_v37 = vcvt.f32.s32 %v719_v63  ;;  %v1186_v58 = vsel %vm1184_vm3, %v2103_v12, %v881_v35  ;;  %v1287_v35 = vsel %vm1286_vm13, %v1270_v24, 0 }
 0x290   :  { %v1025_v28 = vsub.f32 %v945_v9, %v577_v2  ;;  %v1203_v51 = vsel %vm1201_vm5, %v1186_v58, 0 }
 0x291   :  { %v2401_v6 = vadd.s32 %v722_v30, %v720_v37  ;;  %v1220_v12 = vsel %vm1218_vm6, %v1203_v51, 0 }
 0x292   :  { %v1569_v8 = vpop.eup %1568  ;;  %v1042_v27 = vmul.f32 1.442695, %v1025_v28  ;;  %v1237_v10 = vsel %vm1235_vm8, %v1220_v12, 0 }
 0x293   :  { %v1571_v29 = vpop.eup %1570  ;;  %v1076_v36 = vadd.f32 %v1569_v8, %v2396_v41  ;;  %v901_v11 = vand.u32 4294967168, %v2401_v6  ;;  %v1254_v63 = vsel %vm1252_vm10, %v1237_v10, 0 }
 0x294   :  { %1574 = vpow2.f32 %v1042_v27  ;;  %v1072_v2 = vadd.f32 %v1571_v29, %v1567_v47  ;;  %v1573_v16 = vpop.eup %1572  ;;  %1303 = vxpose.xlu1.b32.start [1/16] (narrow) %v1287_v35, 8  ;;  %v1271_v61 = vsel %vm1269_vm11, %v1254_v63, 0 }
 0x295   :  { %vm917_vm12 = vcmp.lt.s32.totalorder %v901_v11, 0  ;;  %v933_v48 = vxor.u32 2147483647, %v901_v11 }
 0x296   :  { %1576 = vrcp.f32 %v1072_v2 }
 0x297   :  { %v949_v49 = vsel %vm917_vm12, %v933_v48, %v901_v11  ;;  %1578 = vpow2.f32 %v1002_v45  ;;  %v536_v11 = vand.u32 4294967168, %v2157_v53  ;;  %v540_v53 = vand.u32 4294967168, %v2132_v1 }
 0x298   :  { %v1029_v40 = vsub.f32 %v949_v49, %v581_v23  ;;  %1580 = vrcp.f32 %v1076_v36  ;;  %v1288_v23 = vsel %vm1286_vm13, %v1271_v61, 0  ;;  %v537_v1 = vand.u32 4294967168, %v2134_v42 }
 0x299   :  { %v568_v49 = vxor.u32 2147483647, %v536_v11  ;;  %vm552_vm14 = vcmp.lt.s32.totalorder %v536_v11, 0  ;;  %vm556_vm0 = vcmp.lt.s32.totalorder %v540_v53, 0 }
 0x29a   :  { %v1575_v57 = vpop.eup %1574  ;;  %v1050_v30 = vmul.f32 1.442695, %v1029_v40  ;;  %vm553_vm2 = vcmp.lt.s32.totalorder %v537_v1, 0 }
 0x29b   :  { %v1073_v9 = vadd.f32 %v1575_v57, %v1573_v16  ;;  %v2425_v63 = vsel %vm552_vm14, %v568_v49, %v536_v11 }
 0x29c   :  { %v1577_v37 = vpop.eup %1576  ;;  %1582 = vpow2.f32 %v1050_v30  ;;  %1304 = vxpose.xlu1.b32.cont [2/16] (narrow) %v1288_v23, 8  ;;  %v530_v30 = vand.u32 4294967168, %v2159_v55  ;;  %v572_v23 = vxor.u32 2147483647, %v540_v53 }
 0x29d   :  { %v1104_v58 = vmul.f32 %v1577_v37, %v1072_v2  ;;  %v2413_v51 = vpop.eup %1578  ;;  %1584 = vrcp.f32 %v1073_v9 }
 0x29e   :  { %v1581_v59 = vpop.eup %1580  ;;  %vm546_vm15 = vcmp.lt.s32.totalorder %v530_v30, 0 }
 0x29f   :  { %v1120_v28 = vsub.f32 2.0, %v1104_v58  ;;  %v1108_v45 = vmul.f32 %v1581_v59, %v1076_v36  ;;  %v984_v36 = vsub.f32 %v2425_v63, %v2425_v63  ;;  %v562_v58 = vxor.u32 2147483647, %v530_v30 }
 0x2a1   :  { %v1136_v27 = vmul.f32 %v1577_v37, %v1120_v28  ;;  %v1124_v10 = vsub.f32 2.0, %v1108_v45  ;;  %v531_v28 = vand.u32 4294967168, %v2194_v26  ;;  %v569_v26 = vxor.u32 2147483647, %v537_v1 }
 0x2a2   :  { %v2416_v19 = vpop.eup %1582 }
 0x2a3   :  { %v1077_v12 = vadd.f32 %v2416_v19, %v2413_v51  ;;  %v1152_v48 = vmul.f32 %v1571_v29, %v1136_v27  ;;  %v1168_v24 = vmul.f32 %v1567_v47, %v1136_v27  ;;  %v1140_v40 = vmul.f32 %v1581_v59, %v1124_v10  ;;  %v1585_v35 = vpop.eup %1584 }
 0x2a4   :  { %v1105_v47 = vmul.f32 %v1585_v35, %v1073_v9  ;;  %v1008_v9 = vmul.f32 1.442695, %v984_v36  ;;  %v578_v27 = vsel %vm546_vm15, %v562_v58, %v530_v30  ;;  %v563_v11 = vxor.u32 2147483647, %v531_v28 }
 0x2a5   :  { %v2422_v2 = vsel %vm1184_vm3, %v1152_v48, %v1168_v24  ;;  %v1156_v37 = vmul.f32 %v2396_v41, %v1140_v40  ;;  %v1172_v61 = vmul.f32 %v1569_v8, %v1140_v40  ;;  %1586 = vrcp.f32 %v1077_v12 }
 0x2a6   :  { %v1121_v55 = vsub.f32 2.0, %v1105_v47  ;;  %v679_v41 = vcvt.f32.s32 %v2311_v21  ;;  %v2437_v48 = vsel %vm556_vm0, %v572_v23, %v540_v53  ;;  %vm547_vm1 = vcmp.lt.s32.totalorder %v531_v28, 0 }
 0x2a7   :  { %v2430_v29 = vsel %vm1184_vm3, %v1156_v37, %v1172_v61  ;;  %v541_v37 = vand.u32 4294967168, %v2136_v7  ;;  %v978_v42 = vsub.f32 %v578_v27, %v578_v27  ;;  %v2443_v61 = vsel %vm547_vm1, %v563_v11, %v531_v28 }
 0x2a8   :  { %v1137_v8 = vmul.f32 %v1585_v35, %v1121_v55  ;;  %v680_v10 = vshll.u32 %v679_v41, 16  ;;  %v538_v30 = vand.u32 4294967168, %v2196_v13  ;;  %1588 = vpow2.f32 %v1008_v9 }
 0x2a9   :  { %v2449_v36 = vsel %vm553_vm2, %v569_v26, %v537_v1  ;;  %v763_v7 = vcvt.f32.s32 %v2327_v3  ;;  %v573_v55 = vxor.u32 2147483647, %v541_v37  ;;  %v979_v28 = vsub.f32 %v2443_v61, %v2443_v61 }
 0x2aa   :  { %v1153_v45 = vmul.f32 %v1573_v16, %v1137_v8  ;;  %v1169_v49 = vmul.f32 %v1575_v57, %v1137_v8  ;;  %v988_v16 = vsub.f32 %v2437_v48, %v2437_v48  ;;  %v850_v57 = vand.u32 65535, %v2316_v17 }
 0x2ab   :  { %v1587_v59 = vpop.eup %1586  ;;  %v570_v41 = vxor.u32 2147483647, %v538_v30  ;;  %vm554_vm7 = vcmp.lt.s32.totalorder %v538_v30, 0  ;;  %vm557_vm12 = vcmp.lt.s32.totalorder %v541_v37, 0 }
 0x2ac   :  { %v2441_v21 = vsel %vm1184_vm3, %v1153_v45, %v1169_v49  ;;  %v1109_v35 = vmul.f32 %v1587_v59, %v1077_v12  ;;  %v996_v12 = vmul.f32 1.442695, %v978_v42  ;;  %v852_v1 = vcvt.s32.f32 %v850_v57 }
 0x2ad   :  { %v677_v24 = vpop.xlane.xlu1 %676  ;;  %v764_v45 = vshll.u32 %v763_v7, 16 }
 0x2ae   :  { %v678_v40 = vcvt.f32.s32 %v677_v24  ;;  %v1125_v47 = vsub.f32 2.0, %v1109_v35  ;;  %1590 = vpow2.f32 %v996_v12  ;;  %v2486_v12 = vand.u32 4294967168, %v2232_v60 }
 0x2af   :  { %v836_v60 = vand.u32 65535, %v2352_v22 }
 0x2b0   :  { %v681_v53 = vadd.s32 %v680_v10, %v678_v40  ;;  %v1141_v13 = vmul.f32 %v1587_v59, %v1125_v47  ;;  %v2460_v59 = vpop.eup %1588  ;;  %vm551_vm15 = vcmp.lt.s32.totalorder %v2486_v12, 0 }
 0x2b2   :  { %v866_v58 = vand.u32 127, %v681_v53  ;;  %v898_v23 = vand.u32 4294967168, %v681_v53  ;;  %v1157_v24 = vmul.f32 %v2413_v51, %v1141_v13  ;;  %v1173_v3 = vmul.f32 %v2416_v19, %v1141_v13 }
 0x2b3   :  { %v2468_v51 = vsel %vm554_vm7, %v570_v41, %v538_v30 }
 0x2b4   :  { %v882_v8 = vsub.s32 127, %v866_v58  ;;  %vm914_vm4 = vcmp.lt.s32.totalorder %v898_v23, 0  ;;  %v930_v9 = vxor.u32 2147483647, %v898_v23  ;;  %v2465_v35 = vsel %vm1184_vm3, %v1157_v24, %v1173_v3 }
 0x2b5   :  { %v2454_v11 = vpop.xlane.xlu1 %854  ;;  %v761_v17 = vpop.xlane.xlu2 %760  ;;  %v2479_v58 = vsel %vm557_vm12, %v573_v55, %v541_v37 }
 0x2b6   :  { %v946_v49 = vsel %vm914_vm4, %v930_v9, %v898_v23  ;;  %v762_v26 = vcvt.f32.s32 %v761_v17  ;;  %vm856_vm9 = vcmp.eq.f32.partialorder %v2329_v32, %v2454_v11  ;;  %v1187_v42 = vsel %vm1184_vm3, %v2172_v33, %v882_v8 }
 0x2b7   :  { %v1026_v10 = vsub.f32 %v946_v49, %v578_v27  ;;  %v857_v40 = vsel %vm856_vm9, %v852_v1, -inf  ;;  %v1204_v53 = vsel %vm1201_vm5, %v1187_v42, 0  ;;  %v791_v32 = vcvt.f32.s32 %v2325_v0 }
 0x2b8   :  { %v2470_v19 = vadd.s32 %v764_v45, %v762_v26  ;;  %858 = vmax.xlane.f32.xlu0 %v857_v40  ;;  %v868_v27 = vand.u32 127, %v2386_v20  ;;  %v1221_v47 = vsel %vm1218_vm6, %v1204_v53, 0  ;;  %v693_v33 = vcvt.f32.s32 %v2342_v15  ;;  %v2494_v26 = vpop.eup %1590 }
 0x2b9   :  { %v1044_v57 = vmul.f32 1.442695, %v1026_v10  ;;  %v1238_v30 = vsel %vm1235_vm8, %v1221_v47, 0  ;;  %v998_v23 = vmul.f32 1.442695, %v979_v28  ;;  %v986_v0 = vsub.f32 %v2468_v51, %v2468_v51 }
 0x2ba   :  { %v904_v7 = vand.u32 4294967168, %v2470_v19  ;;  %v1255_v13 = vsel %vm1252_vm10, %v1238_v30, 0  ;;  %v792_v15 = vshll.u32 %v791_v32, 16  ;;  %v884_v8 = vsub.s32 127, %v868_v27 }
 0x2bb   :  { %1592 = vpow2.f32 %v1044_v57  ;;  %v1272_v41 = vsel %vm1269_vm11, %v1255_v13, 0  ;;  %v694_v28 = vshll.u32 %v693_v33, 16  ;;  %v989_v3 = vsub.f32 %v2479_v58, %v2479_v58 }
 0x2bc   :  { %vm920_vm14 = vcmp.lt.s32.totalorder %v904_v7, 0  ;;  %v936_v20 = vxor.u32 2147483647, %v904_v7  ;;  %v1289_v37 = vsel %vm1286_vm13, %v1272_v41, 0  ;;  %v833_v45 = vcvt.f32.s32 %v2309_v38 }
 0x2bd   :  { %v789_v9 = vpop.xlane.xlu1 %788  ;;  %v691_v55 = vpop.xlane.xlu0 %690  ;;  %1305 = vxpose.xlu1.b32.cont [3/16] (narrow) %v1289_v37, 8  ;;  %1594 = vpow2.f32 %v998_v23  ;;  %v1012_v10 = vmul.f32 1.442695, %v986_v0  ;;  %v567_v32 = vxor.u32 2147483647, %v2486_v12  ;;  %v1189_v38 = vsel %vm1184_vm3, %v2088_v14, %v884_v8 }
 0x2be   :  { %v952_v17 = vsel %vm920_vm14, %v936_v20, %v904_v7  ;;  %v790_v1 = vcvt.f32.s32 %v789_v9  ;;  %v692_v24 = vcvt.f32.s32 %v691_v55  ;;  %v834_v33 = vshll.u32 %v833_v45, 16 }
 0x2bf   :  { %v1032_v49 = vsub.f32 %v952_v17, %v2425_v63  ;;  %v869_v63 = vand.u32 127, %v2401_v6  ;;  %v838_v30 = vcvt.s32.f32 %v836_v60  ;;  %v735_v23 = vcvt.f32.s32 %v2365_v39 }
 0x2c0   :  { %v2496_v40 = vadd.s32 %v792_v15, %v790_v1  ;;  %v695_v42 = vadd.s32 %v694_v28, %v692_v24  ;;  %v749_v13 = vcvt.f32.s32 %v2367_v50  ;;  %v1206_v15 = vsel %vm1201_vm5, %v1189_v38, 0 }
 0x2c1   :  { %v2498_v53 = vpop.eup %1592  ;;  %v1056_v27 = vmul.f32 1.442695, %v1032_v49  ;;  %v885_v9 = vsub.s32 127, %v869_v63  ;;  %v1223_v60 = vsel %vm1218_vm6, %v1206_v15, 0  ;;  %v1018_v38 = vmul.f32 1.442695, %v989_v3 }
 0x2c2   :  { %v2507_v22 = vadd.f32 %v2498_v53, %v2494_v26  ;;  %v906_v57 = vand.u32 4294967168, %v2496_v40  ;;  %v867_v47 = vand.u32 127, %v695_v42  ;;  %v899_v7 = vand.u32 4294967168, %v695_v42 }
 0x2c3   :  { %1596 = vpow2.f32 %v1056_v27  ;;  %v2515_v8 = vpop.eup %1594  ;;  %v1190_v27 = vsel %vm1184_vm3, %v2117_v5, %v885_v9  ;;  %v1240_v5 = vsel %vm1235_vm8, %v1223_v60, 0 }
 0x2c4   :  { %vm922_vm0 = vcmp.lt.s32.totalorder %v906_v57, 0  ;;  %v938_v0 = vxor.u32 2147483647, %v906_v57  ;;  %v883_v14 = vsub.s32 127, %v867_v47  ;;  %vm915_vm1 = vcmp.lt.s32.totalorder %v899_v7, 0 }
 0x2c5   :  { %v931_v6 = vxor.u32 2147483647, %v899_v7  ;;  %v831_v20 = vpop.xlane.xlu1 %830  ;;  %v2512_v41 = vpop.xlane.xlu0 %840  ;;  %1598 = vrcp.f32 %v2507_v22  ;;  %v750_v47 = vshll.u32 %v749_v13, 16  ;;  %v1207_v3 = vsel %vm1201_vm5, %v1190_v27, 0 }
 0x2c6   :  { %v954_v37 = vsel %vm922_vm0, %v938_v0, %v906_v57  ;;  %v832_v55 = vcvt.f32.s32 %v831_v20  ;;  %vm842_vm2 = vcmp.eq.f32.partialorder %v2362_v34, %v2512_v41  ;;  %v1188_v17 = vsel %vm1184_vm3, %v2229_v52, %v883_v14 }
 0x2c7   :  { %v1034_v39 = vsub.f32 %v954_v37, %v2468_v51  ;;  %v947_v50 = vsel %vm915_vm1, %v931_v6, %v899_v7  ;;  %v843_v28 = vsel %vm842_vm2, %v838_v30, -inf  ;;  %v1205_v45 = vsel %vm1201_vm5, %v1188_v17, 0 }
 0x2c8   :  { %v1027_v1 = vsub.f32 %v947_v50, %v2443_v61  ;;  %v2524_v24 = vadd.s32 %v834_v33, %v832_v55  ;;  %844 = vmax.xlane.f32.xlu2 %v843_v28  ;;  %1600 = vpow2.f32 %v1012_v10  ;;  %v1222_v51 = vsel %vm1218_vm6, %v1205_v45, 0 }
 0x2c9   :  { %v2527_v49 = vpop.eup %1596  ;;  %v1060_v34 = vmul.f32 1.442695, %v1034_v39  ;;  %v2541_v10 = vsel %vm551_vm15, %v567_v32, %v2486_v12  ;;  %v1239_v63 = vsel %vm1235_vm8, %v1222_v51, 0  ;;  %v736_v57 = vshll.u32 %v735_v23, 16 }
 0x2ca   :  { %v2533_v52 = vadd.f32 %v2527_v49, %v2460_v59  ;;  %v1046_v42 = vmul.f32 1.442695, %v1027_v1  ;;  %v909_v61 = vand.u32 4294967168, %v2524_v24  ;;  %v1256_v30 = vsel %vm1252_vm10, %v1239_v63, 0 }
 0x2cb   :  { %1602 = vpow2.f32 %v1060_v34  ;;  %v1599_v14 = vpop.eup %1598  ;;  %v1273_v32 = vsel %vm1269_vm11, %v1256_v30, 0  ;;  %v2553_v23 = vmul.f32 1.442695, %v988_v16  ;;  %v985_v13 = vsub.f32 %v2449_v36, %v2449_v36 }
 0x2cc   :  { %vm925_vm4 = vcmp.lt.s32.totalorder %v909_v61, 0  ;;  %v941_v33 = vxor.u32 2147483647, %v909_v61  ;;  %1604 = vpow2.f32 %v1046_v42  ;;  %v1290_v37 = vsel %vm1286_vm13, %v1273_v32, 0 }
 0x2cd   :  { %v747_v7 = vpop.xlane.xlu1 %746  ;;  %v733_v0 = vpop.xlane.xlu0 %732  ;;  %1306 = vxpose.xlu1.b32.cont [4/16] (narrow) %v1290_v37, 8  ;;  %v1257_v50 = vsel %vm1252_vm10, %v1240_v5, 0  ;;  %v1224_v28 = vsel %vm1218_vm6, %v1207_v3, 0  ;;  %1606 = vpow2.f32 %v1018_v38  ;;  %v983_v16 = vsub.f32 %v2541_v10, %v2541_v10 }
 0x2ce   :  { %v957_v6 = vsel %vm925_vm4, %v941_v33, %v909_v61  ;;  %v748_v12 = vcvt.f32.s32 %v747_v7  ;;  %v734_v20 = vcvt.f32.s32 %v733_v0  ;;  %v2548_v15 = vpop.eup %1600  ;;  %v777_v45 = vcvt.f32.s32 %v2323_v62 }
 0x2cf   :  { %v1037_v9 = vsub.f32 %v957_v6, %v2479_v58  ;;  %v1106_v58 = vmul.f32 %v1599_v14, %v2507_v22  ;;  %v2575_v42 = vand.u32 4294967168, %v2155_v18  ;;  %v1274_v61 = vsel %vm1269_vm11, %v1257_v50, 0 }
 0x2d0   :  { %v751_v55 = vadd.s32 %v750_v47, %v748_v12  ;;  %v737_v39 = vadd.s32 %v736_v57, %v734_v20  ;;  %802 = vmax.xlane.f32.xlu2 %v2358_v25  ;;  %v1241_v27 = vsel %vm1235_vm8, %v1224_v28, 0  ;;  %v1006_v38 = vmul.f32 1.442695, %v983_v16 }
 0x2d1   :  { %v2562_v17 = vpop.eup %1602  ;;  %v1066_v1 = vmul.f32 1.442695, %v1037_v9  ;;  %v1122_v33 = vsub.f32 2.0, %v1106_v58  ;;  %v778_v7 = vshll.u32 %v777_v45, 16  ;;  %v819_v18 = vcvt.f32.s32 %v2347_v31 }
 0x2d2   :  { %v2570_v34 = vadd.f32 %v2562_v17, %v2548_v15  ;;  %v903_v25 = vand.u32 4294967168, %v751_v55  ;;  %v870_v51 = vand.u32 127, %v737_v39  ;;  %v2572_v60 = vpop.eup %1604  ;;  %v871_v22 = vand.u32 127, %v751_v55 }
 0x2d3   :  { %1608 = vpow2.f32 %v1066_v1  ;;  %v1075_v62 = vadd.f32 %v2572_v60, %v2515_v8  ;;  %v1291_v30 = vsel %vm1286_vm13, %v1274_v61, 0  ;;  %v2584_v5 = vpop.eup %1606  ;;  %v1258_v6 = vsel %vm1252_vm10, %v1241_v27, 0 }
 0x2d4   :  { %1610 = vrcp.f32 %v2533_v52  ;;  %vm919_vm7 = vcmp.lt.s32.totalorder %v903_v25, 0  ;;  %v935_v63 = vxor.u32 2147483647, %v903_v25  ;;  %v886_v57 = vsub.s32 127, %v870_v51 }
 0x2d5   :  { %v775_v47 = vpop.xlane.xlu0 %774  ;;  %1612 = vrcp.f32 %v1075_v62  ;;  %v887_v32 = vsub.s32 127, %v871_v22  ;;  %1307 = vxpose.xlu1.b32.cont [5/16] (narrow) %v1291_v30, 8  ;;  %v1010_v55 = vmul.f32 1.442695, %v985_v13  ;;  %vm550_vm9 = vcmp.lt.s32.totalorder %v2575_v42, 0 }
 0x2d6   :  { %v776_v0 = vcvt.f32.s32 %v775_v47  ;;  %v951_v3 = vsel %vm919_vm7, %v935_v63, %v903_v25  ;;  %v1191_v12 = vsel %vm1184_vm3, %v2183_v46, %v886_v57  ;;  %1614 = vpow2.f32 %v1006_v38 }
 0x2d7   :  { %v1031_v20 = vsub.f32 %v951_v3, %v2541_v10  ;;  %v1208_v31 = vsel %vm1201_vm5, %v1191_v12, 0  ;;  %v1138_v50 = vmul.f32 %v1599_v14, %v1122_v33  ;;  %v872_v16 = vand.u32 127, %v2470_v19  ;;  %v2931_v19 = vld [vmem:[#allocation16_spill] sm:$0xff] }
 0x2d8   :  { %v2590_v9 = vadd.s32 %v778_v7, %v776_v0  ;;  %v1275_v1 = vsel %vm1269_vm11, %v1258_v6, 0  ;;  %v902_v58 = vand.u32 4294967168, %v737_v39  ;;  %v1225_v25 = vsel %vm1218_vm6, %v1208_v31, 0 }
 0x2d9   :  { %v2593_v37 = vpop.eup %1608  ;;  %v1054_v10 = vmul.f32 1.442695, %v1031_v20  ;;  %v1154_v13 = vmul.f32 %v2494_v26, %v1138_v50  ;;  %v566_v51 = vxor.u32 2147483647, %v2575_v42  ;;  %v820_v14 = vshll.u32 %v819_v18, 16 }
 0x2da   :  { %v1611_v28 = vpop.eup %1610  ;;  %v2599_v46 = vadd.f32 %v2593_v37, %v2584_v5  ;;  %v905_v45 = vand.u32 4294967168, %v2590_v9  ;;  %1616 = vrcp.f32 %v2570_v34  ;;  %v1192_v61 = vsel %vm1184_vm3, %v2931_v19, %v887_v32 }
 0x2db   :  { %v1613_v27 = vpop.eup %1612  ;;  %1618 = vpow2.f32 %v1054_v10  ;;  %v1112_v39 = vmul.f32 %v1611_v28, %v2533_v52  ;;  %v888_v63 = vsub.s32 127, %v872_v16  ;;  %v1292_v57 = vsel %vm1286_vm13, %v1275_v1, 0  ;;  %v2932_v16 = vld [vmem:[#allocation12_spill] sm:$0xff] }
 0x2dc   :  { %vm921_vm12 = vcmp.lt.s32.totalorder %v905_v45, 0  ;;  %v937_v22 = vxor.u32 2147483647, %v905_v45  ;;  %v1242_v26 = vsel %vm1235_vm8, %v1225_v25, 0  ;;  %v2612_v33 = vpop.eup %1614  ;;  %vm918_vm14 = vcmp.lt.s32.totalorder %v902_v58, 0 }
 0x2dd   :  { %v817_v38 = vpop.xlane.xlu0 %816  ;;  %v934_v7 = vxor.u32 2147483647, %v902_v58  ;;  %v1170_v30 = vmul.f32 %v2498_v53, %v1138_v50  ;;  %1308 = vxpose.xlu1.b32.cont [6/16] (narrow) %v1292_v57, 8  ;;  %v1209_v52 = vsel %vm1201_vm5, %v1192_v61, 0  ;;  %v1107_v6 = vmul.f32 %v1613_v27, %v1075_v62 }
 0x2de   :  { %v818_v47 = vcvt.f32.s32 %v817_v38  ;;  %v953_v18 = vsel %vm921_vm12, %v937_v22, %v905_v45  ;;  %1620 = vpow2.f32 %v1010_v55  ;;  %v1259_v12 = vsel %vm1252_vm10, %v1242_v26, 0 }
 0x2df   :  { %v1033_v0 = vsub.f32 %v953_v18, %v2449_v36  ;;  %v2621_v32 = vsel %vm1184_vm3, %v1154_v13, %v1170_v30  ;;  %v1128_v20 = vsub.f32 2.0, %v1112_v39  ;;  %v582_v53 = vsel %vm550_vm9, %v566_v51, %v2575_v42 }
 0x2e0   :  { %v2616_v3 = vadd.s32 %v820_v14, %v818_v47  ;;  %v1617_v31 = vpop.eup %1616  ;;  %v1193_v10 = vsel %vm1184_vm3, %v2932_v16, %v888_v63  ;;  %v950_v62 = vsel %vm918_vm14, %v934_v7, %v902_v58  ;;  %v1226_v55 = vsel %vm1218_vm6, %v1209_v52, 0 }
 0x2e1   :  { %v1058_v50 = vmul.f32 1.442695, %v1033_v0  ;;  %v2629_v1 = vpop.eup %1618  ;;  %v1123_v45 = vsub.f32 2.0, %v1107_v6  ;;  %v1144_v25 = vmul.f32 %v1611_v28, %v1128_v20  ;;  %v1276_v42 = vsel %vm1269_vm11, %v1259_v12, 0 }
 0x2e2   :  { %v908_v36 = vand.u32 4294967168, %v2616_v3  ;;  %v1079_v13 = vadd.f32 %v2629_v1, %v2612_v33  ;;  %v873_v51 = vand.u32 127, %v2590_v9  ;;  %v1351_v19 = vsel %vm1201_vm5, %v2422_v2, 0.0 }
 0x2e3   :  { %1622 = vpow2.f32 %v1058_v50  ;;  %v1114_v61 = vmul.f32 %v1617_v31, %v2570_v34  ;;  %v1243_v58 = vsel %vm1235_vm8, %v1226_v55, 0  ;;  %v1210_v28 = vsel %vm1201_vm5, %v1193_v10, 0  ;;  %v2933_v50 = vld [vmem:[#allocation9_spill] sm:$0xff] }
 0x2e4   :  { %vm924_vm15 = vcmp.lt.s32.totalorder %v908_v36, 0  ;;  %v940_v14 = vxor.u32 2147483647, %v908_v36  ;;  %1624 = vrcp.f32 %v1079_v13  ;;  %v1139_v22 = vmul.f32 %v1613_v27, %v1123_v45  ;;  %v2642_v38 = vpop.eup %1620 }
 0x2e5   :  { %v1030_v39 = vsub.f32 %v950_v62, %v582_v53  ;;  %v1293_v57 = vsel %vm1286_vm13, %v1276_v42, 0  ;;  %v1160_v9 = vmul.f32 %v2460_v59, %v1144_v25  ;;  %1626 = vrcp.f32 %v2599_v46 }
 0x2e6   :  { %v956_v63 = vsel %vm924_vm15, %v940_v14, %v908_v36  ;;  %1309 = vxpose.xlu1.b32.cont [7/16] (narrow) %v1293_v57, 8  ;;  %v1155_v34 = vmul.f32 %v2515_v8, %v1139_v22  ;;  %v1171_v47 = vmul.f32 %v2572_v60, %v1139_v22  ;;  %v889_v26 = vsub.s32 127, %v873_v51 }
 0x2e7   :  { %v1036_v2 = vsub.f32 %v956_v63, %v2437_v48  ;;  %v1260_v27 = vsel %vm1252_vm10, %v1243_v58, 0  ;;  %v1176_v7 = vmul.f32 %v2527_v49, %v1144_v25  ;;  %v1130_v18 = vsub.f32 2.0, %v1114_v61 }
 0x2e8   :  { %1628 = vpow2.f32 %v2553_v23  ;;  %v982_v59 = vsub.f32 %v582_v53, %v582_v53  ;;  %v2656_v52 = vsel %vm1184_vm3, %v1155_v34, %v1171_v47  ;;  %v1227_v8 = vsel %vm1218_vm6, %v1210_v28, 0  ;;  %v2934_v47 = vld [vmem:[#allocation14_spill] sm:$0xff] }
 0x2e9   :  { %v2652_v30 = vpop.eup %1622  ;;  %v1064_v0 = vmul.f32 1.442695, %v1036_v2  ;;  %v2662_v60 = vsel %vm1184_vm3, %v1160_v9, %v1176_v7  ;;  %v1146_v6 = vmul.f32 %v1617_v31, %v1130_v18  ;;  %v1052_v12 = vmul.f32 1.442695, %v1030_v39 }
 0x2ea   :  { %v1081_v48 = vadd.f32 %v2652_v30, %v2642_v38  ;;  %v1625_v49 = vpop.eup %1624  ;;  %v1277_v20 = vsel %vm1269_vm11, %v1260_v27, 0  ;;  %v1367_v23 = vsel %vm1218_vm6, %v1351_v19, 0.0  ;;  %v874_v53 = vand.u32 127, %v2496_v40 }
 0x2eb   :  { %1630 = vpow2.f32 %v1064_v0  ;;  %v1194_v36 = vsel %vm1184_vm3, %v2933_v50, %v889_v26  ;;  %v1162_v16 = vmul.f32 %v2548_v15, %v1146_v6  ;;  %v1627_v10 = vpop.eup %1626  ;;  %v1004_v62 = vmul.f32 1.442695, %v982_v59 }
 0x2ec   :  { %1632 = vrcp.f32 %v1081_v48  ;;  %v1244_v55 = vsel %vm1235_vm8, %v1227_v8, 0  ;;  %v1178_v31 = vmul.f32 %v2562_v17, %v1146_v6  ;;  %v1294_v45 = vsel %vm1286_vm13, %v1277_v20, 0 }
 0x2ed   :  { %v1383_v25 = vsel %vm1235_vm8, %v1367_v23, 0.0  ;;  %v1111_v42 = vmul.f32 %v1625_v49, %v1079_v13  ;;  %1634 = vpow2.f32 %v1052_v12  ;;  %v1211_v40 = vsel %vm1201_vm5, %v1194_v36, 0 }
 0x2ee   :  { %v2674_v51 = vpop.eup %1628  ;;  %1310 = vxpose.xlu1.b32.cont [8/16] (narrow) %v1294_v45, 8  ;;  %v2678_v15 = vsel %vm1184_vm3, %v1162_v16, %v1178_v31  ;;  %v890_v14 = vsub.s32 127, %v874_v53  ;;  %v1261_v19 = vsel %vm1252_vm10, %v1244_v55, 0  ;;  %v1352_v17 = vsel %vm1201_vm5, %v2441_v21, 0.0 }
 0x2ef   :  { %v1127_v61 = vsub.f32 2.0, %v1111_v42  ;;  %1636 = vpow2.f32 %v1004_v62  ;;  %v1399_v13 = vsel %vm1252_vm10, %v1383_v25, 0.0  ;;  %v1117_v28 = vmul.f32 %v1627_v10, %v2599_v46 }
 0x2f0   :  { %v1228_v39 = vsel %vm1218_vm6, %v1211_v40, 0  ;;  %v1278_v9 = vsel %vm1269_vm11, %v1261_v19, 0  ;;  %v1368_v2 = vsel %vm1218_vm6, %v1352_v17, 0.0  ;;  %v1415_v34 = vsel %vm1269_vm11, %v1399_v13, 0.0 }
 0x2f1   :  { %v2683_v58 = vpop.eup %1630  ;;  %v1143_v63 = vmul.f32 %v1625_v49, %v1127_v61  ;;  %v1133_v21 = vsub.f32 2.0, %v1117_v28  ;;  %v1195_v26 = vsel %vm1184_vm3, %v2934_v47, %v890_v14  ;;  %v1245_v7 = vsel %vm1235_vm8, %v1228_v39, 0 }
 0x2f2   :  { %v1084_v22 = vadd.f32 %v2683_v58, %v2674_v51  ;;  %v1633_v57 = vpop.eup %1632  ;;  %v1295_v59 = vsel %vm1286_vm13, %v1278_v9, 0  ;;  %v1384_v0 = vsel %vm1235_vm8, %v1368_v2, 0.0  ;;  %v1431_v49 = vsel %vm1286_vm13, %v1415_v34, 0.0 }
 0x2f3   :  { %v1159_v27 = vmul.f32 %v2612_v33, %v1143_v63  ;;  %v2696_v46 = vpop.eup %1634  ;;  %v1175_v18 = vmul.f32 %v2629_v1, %v1143_v63  ;;  %v1113_v8 = vmul.f32 %v1633_v57, %v1081_v48  ;;  %v1212_v12 = vsel %vm1201_vm5, %v1195_v26, 0 }
 0x2f4   :  { %1638 = vrcp.f32 %v1084_v22  ;;  %v1149_v20 = vmul.f32 %v1627_v10, %v1133_v21  ;;  %v1262_v1 = vsel %vm1252_vm10, %v1245_v7, 0  ;;  %v1353_v53 = vsel %vm1201_vm5, %v2621_v32, 0.0 }
 0x2f5   :  { %v1637_v6 = vpop.eup %1636  ;;  %v2705_v33 = vsel %vm1184_vm3, %v1159_v27, %v1175_v18  ;;  %v1129_v50 = vsub.f32 2.0, %v1113_v8  ;;  %v1400_v48 = vsel %vm1252_vm10, %v1384_v0, 0.0  ;;  %v1229_v62 = vsel %vm1218_vm6, %v1212_v12, 0 }
 0x2f6   :  { %1311 = vxpose.xlu1.b32.cont [9/16] (narrow) %v1295_v59, 8  ;;  %v1078_v23 = vadd.f32 %v1637_v6, %v2696_v46  ;;  %v1165_v36 = vmul.f32 %v2584_v5, %v1149_v20  ;;  %v1181_v16 = vmul.f32 %v2593_v37, %v1149_v20  ;;  %v1279_v10 = vsel %vm1269_vm11, %v1262_v1, 0 }
 0x2f7   :  { %v1145_v55 = vmul.f32 %v1633_v57, %v1129_v50  ;;  %v1369_v45 = vsel %vm1218_vm6, %v1353_v53, 0.0  ;;  %v1416_v32 = vsel %vm1269_vm11, %v1400_v48, 0.0  ;;  %v1246_v37 = vsel %vm1235_vm8, %v1229_v62, 0 }
 0x2f8   :  { %v2718_v25 = vsel %vm1184_vm3, %v1165_v36, %v1181_v16  ;;  %1640 = vrcp.f32 %v1078_v23  ;;  %v1296_v40 = vsel %vm1286_vm13, %v1279_v10, 0  ;;  %v1385_v14 = vsel %vm1235_vm8, %v1369_v45, 0.0 }
 0x2f9   :  { %1447 = vxpose.xlu2.b32.start [1/16] (narrow) %v1431_v49, 8  ;;  %v1161_v42 = vmul.f32 %v2642_v38, %v1145_v55  ;;  %v1177_v5 = vmul.f32 %v2652_v30, %v1145_v55  ;;  %v1432_v61 = vsel %vm1286_vm13, %v1416_v32, 0.0  ;;  %v1263_v13 = vsel %vm1252_vm10, %v1246_v37, 0 }
 0x2fa   :  { %v1639_v31 = vpop.eup %1638  ;;  %v1354_v38 = vsel %vm1201_vm5, %v2656_v52, 0.0  ;;  %v1401_v28 = vsel %vm1252_vm10, %v1385_v14, 0.0  ;;  %v1280_v57 = vsel %vm1269_vm11, %v1263_v13, 0  ;;  %v1355_v7 = vsel %vm1201_vm5, %v2430_v29, 0.0 }
 0x2fb   :  { %v2727_v19 = vsel %vm1184_vm3, %v1161_v42, %v1177_v5  ;;  %v1116_v17 = vmul.f32 %v1639_v31, %v1084_v22  ;;  %v1370_v9 = vsel %vm1218_vm6, %v1354_v38, 0.0  ;;  %v1417_v22 = vsel %vm1269_vm11, %v1401_v28, 0.0 }
 0x2fc   :  { %v1297_v47 = vsel %vm1286_vm13, %v1280_v57, 0  ;;  %v1386_v52 = vsel %vm1235_vm8, %v1370_v9, 0.0  ;;  %v1433_v27 = vsel %vm1286_vm13, %v1417_v22, 0.0  ;;  %v1356_v12 = vsel %vm1201_vm5, %v2465_v35, 0.0 }
 0x2fd   :  { %v1132_v30 = vsub.f32 2.0, %v1116_v17  ;;  %v1402_v18 = vsel %vm1252_vm10, %v1386_v52, 0.0  ;;  %v1372_v1 = vsel %vm1218_vm6, %v1356_v12, 0.0  ;;  %v543_v32 = vand.u32 4294967168, %v2300_v56 }
 0x2fe   :  { %1312 = vxpose.xlu1.b32.cont [10/16] (narrow) %v1296_v40, 8  ;;  %v1641_v39 = vpop.eup %1640  ;;  %v1418_v59 = vsel %vm1269_vm11, %v1402_v18, 0.0  ;;  %v1388_v48 = vsel %vm1235_vm8, %v1372_v1, 0.0  ;;  %v861_v37 = vcvt.f32.s32 %v2454_v11  ;;  %v1359_v17 = vsel %vm1201_vm5, %v2662_v60, 0.0 }
 0x2ff   :  { %v1148_v63 = vmul.f32 %v1639_v31, %v1132_v30  ;;  %v1110_v34 = vmul.f32 %v1641_v39, %v1078_v23  ;;  %v1434_v49 = vsel %vm1286_vm13, %v1418_v59, 0.0  ;;  %v1404_v35 = vsel %vm1252_vm10, %v1388_v48, 0.0 }
 0x300   :  { %v1358_v31 = vsel %vm1201_vm5, %v2705_v33, 0.0  ;;  %v575_v14 = vxor.u32 2147483647, %v543_v32  ;;  %vm559_vm0 = vcmp.lt.s32.totalorder %v543_v32, 0  ;;  %v862_v13 = vshll.u32 %v861_v37, 16 }
 0x301   :  { %1448 = vxpose.xlu2.b32.cont [2/16] (narrow) %v1432_v61, 8  ;;  %v1164_v2 = vmul.f32 %v2674_v51, %v1148_v63  ;;  %v1180_v21 = vmul.f32 %v2683_v58, %v1148_v63  ;;  %v1126_v51 = vsub.f32 2.0, %v1110_v34  ;;  %v1371_v58 = vsel %vm1218_vm6, %v1355_v7, 0.0 }
 0x302   :  { %v1387_v8 = vsel %vm1235_vm8, %v1371_v58, 0.0  ;;  %v1374_v45 = vsel %vm1218_vm6, %v1358_v31, 0.0  ;;  %v1375_v56 = vsel %vm1218_vm6, %v1359_v17, 0.0  ;;  %v591_v30 = vsel %vm559_vm0, %v575_v14, %v543_v32 }
 0x303   :  { %v2742_v26 = vsel %vm1184_vm3, %v1164_v2, %v1180_v21  ;;  %v1142_v0 = vmul.f32 %v1641_v39, %v1126_v51  ;;  %v1403_v20 = vsel %vm1252_vm10, %v1387_v8, 0.0  ;;  %v1390_v5 = vsel %vm1235_vm8, %v1374_v45, 0.0 }
 0x304   :  { %v1419_v53 = vsel %vm1269_vm11, %v1403_v20, 0.0  ;;  %v1406_v33 = vsel %vm1252_vm10, %v1390_v5, 0.0  ;;  %v1391_v11 = vsel %vm1235_vm8, %v1375_v56, 0.0  ;;  %v991_v63 = vsub.f32 %v591_v30, %v591_v30 }
 0x305   :  { %v1158_v23 = vmul.f32 %v1637_v6, %v1142_v0  ;;  %v1174_v29 = vmul.f32 %v2696_v46, %v1142_v0  ;;  %v1435_v36 = vsel %vm1286_vm13, %v1419_v53, 0.0  ;;  %v1420_v6 = vsel %vm1269_vm11, %v1404_v35, 0.0  ;;  %v2935_v0 = vld [vmem:[#allocation13_spill] sm:$0xff] }
 0x306   :  { %1313 = vxpose.xlu1.b32.cont [11/16] (narrow) %v1297_v47, 8  ;;  %v1436_v55 = vsel %vm1286_vm13, %v1420_v6, 0.0  ;;  %v1422_v28 = vsel %vm1269_vm11, %v1406_v33, 0.0  ;;  %v1360_v9 = vsel %vm1201_vm5, %v2727_v19, 0.0  ;;  %v1407_v2 = vsel %vm1252_vm10, %v1391_v11, 0.0 }
 0x307   :  { %v1341_v50 = vsel %vm1184_vm3, %v1158_v23, %v1174_v29  ;;  %v1438_v60 = vsel %vm1286_vm13, %v1422_v28, 0.0  ;;  %v542_v21 = vand.u32 4294967168, %v2318_v44  ;;  %v1022_v34 = vmul.f32 1.442695, %v991_v63  ;;  %v2936_v28 = vld [vmem:[#allocation11_spill] sm:$0xff] }
 0x308   :  { %v1357_v16 = vsel %vm1201_vm5, %v1341_v50, 0.0  ;;  %v1376_v52 = vsel %vm1218_vm6, %v1360_v9, 0.0  ;;  %v1423_v7 = vsel %vm1269_vm11, %v1407_v2, 0.0  ;;  %v847_v19 = vcvt.f32.s32 %v2512_v41 }
 0x309   :  { %1449 = vxpose.xlu2.b32.cont [3/16] (narrow) %v1433_v27, 8  ;;  %v1373_v62 = vsel %vm1218_vm6, %v1357_v16, 0.0  ;;  %v1392_v51 = vsel %vm1235_vm8, %v1376_v52, 0.0  ;;  %v574_v58 = vxor.u32 2147483647, %v542_v21  ;;  %1642 = vpow2.f32 %v1022_v34 }
 0x30a   :  { %v1389_v46 = vsel %vm1235_vm8, %v1373_v62, 0.0  ;;  %v1439_v59 = vsel %vm1286_vm13, %v1423_v7, 0.0  ;;  %vm558_vm2 = vcmp.lt.s32.totalorder %v542_v21, 0  ;;  %v1361_v44 = vsel %vm1201_vm5, %v2678_v15, 0.0 }
 0x30b   :  { %v1405_v10 = vsel %vm1252_vm10, %v1389_v46, 0.0  ;;  %v539_v8 = vand.u32 4294967168, %v2935_v0  ;;  %v590_v20 = vsel %vm558_vm2, %v574_v58, %v542_v21  ;;  %v848_v23 = vshll.u32 %v847_v19, 16 }
 0x30c   :  { %v1421_v42 = vsel %vm1269_vm11, %v1405_v10, 0.0  ;;  %v1377_v1 = vsel %vm1218_vm6, %v1361_v44, 0.0  ;;  %v805_v16 = vcvt.f32.s32 %v2349_v4  ;;  %v876_v62 = vand.u32 127, %v2616_v3 }
 0x30d   :  { %v1437_v40 = vsel %vm1286_vm13, %v1421_v42, 0.0  ;;  %vm555_vm4 = vcmp.lt.s32.totalorder %v539_v8, 0  ;;  %v571_v15 = vxor.u32 2147483647, %v539_v8  ;;  %v1393_v35 = vsel %vm1235_vm8, %v1377_v1, 0.0 }
 0x30e   :  { %v1409_v10 = vsel %vm1252_vm10, %v1393_v35, 0.0  ;;  %v806_v42 = vshll.u32 %v805_v16, 16  ;;  %v892_v5 = vsub.s32 127, %v876_v62 }
 0x30f   :  { %v2801_v53 = vpop.eup %1642  ;;  %v587_v45 = vsel %vm555_vm4, %v571_v15, %v539_v8  ;;  %v1425_v14 = vsel %vm1269_vm11, %v1409_v10, 0.0 }
 0x310   :  { %v987_v33 = vsub.f32 %v587_v45, %v587_v45  ;;  %v1197_v11 = vsel %vm1184_vm3, %v2936_v28, %v892_v5 }
 0x311   :  { %1450 = vxpose.xlu2.b32.cont [4/16] (narrow) %v1434_v49, 8  ;;  %v1408_v49 = vsel %vm1252_vm10, %v1392_v51, 0.0 }
 0x312   :  { %v1424_v41 = vsel %vm1269_vm11, %v1408_v49, 0.0  ;;  %v1014_v9 = vmul.f32 1.442695, %v987_v33 }
 0x319   :  { %1451 = vxpose.xlu2.b32.cont [5/16] (narrow) %v1435_v36, 8  ;;  %v990_v36 = vsub.f32 %v590_v20, %v590_v20 }
 0x31b   :  { %v1020_v32 = vmul.f32 1.442695, %v990_v36 }
 0x321   :  { %1452 = vxpose.xlu2.b32.cont [6/16] (narrow) %v1436_v55, 8  ;;  %v1440_v55 = vsel %vm1286_vm13, %v1424_v41, 0.0 }
 0x329   :  { %1453 = vxpose.xlu2.b32.cont [7/16] (narrow) %v1437_v40, 8 }
 0x32b   :  { %v859_v61 = vpop.xlane.xlu0 %858 }
 0x32c   :  { %v860_v38 = vcvt.f32.s32 %v859_v61  ;;  %v877_v61 = vand.u32 127, %v2524_v24  ;;  %v2937_v24 = vld [vmem:[#allocation15_spill] sm:$0xff] }
 0x32e   :  { %v2781_v39 = vadd.s32 %v862_v13, %v860_v38  ;;  %v893_v2 = vsub.s32 127, %v877_v61 }
 0x330   :  { %v911_v57 = vand.u32 4294967168, %v2781_v39  ;;  %v879_v10 = vand.u32 127, %v2781_v39 }
 0x331   :  { %1454 = vxpose.xlu2.b32.cont [8/16] (narrow) %v1438_v60, 8 }
 0x332   :  { %vm927_vm1 = vcmp.lt.s32.totalorder %v911_v57, 0  ;;  %v943_v22 = vxor.u32 2147483647, %v911_v57  ;;  %v895_v5 = vsub.s32 127, %v879_v10 }
 0x334   :  { %v959_v47 = vsel %vm927_vm1, %v943_v22, %v911_v57  ;;  %v1214_v22 = vsel %vm1201_vm5, %v1197_v11, 0 }
 0x335   :  { %v1039_v27 = vsub.f32 %v959_v47, %v591_v30  ;;  %v1441_v30 = vsel %vm1286_vm13, %v1425_v14, 0.0  ;;  %v1231_v51 = vsel %vm1218_vm6, %v1214_v22, 0 }
 0x337   :  { %v1070_v18 = vmul.f32 1.442695, %v1039_v27 }
 0x339   :  { %1644 = vpow2.f32 %v1070_v18  ;;  %1455 = vxpose.xlu2.b32.cont [9/16] (narrow) %v1439_v59, 8 }
 0x33b   :  { %v845_v12 = vpop.xlane.xlu2 %844 }
 0x33c   :  { %v846_v29 = vcvt.f32.s32 %v845_v12  ;;  %v2938_v12 = vld [vmem:[#allocation10_spill] sm:$0xff] }
 0x33e   :  { %v2803_v50 = vadd.s32 %v848_v23, %v846_v29  ;;  %v1248_v29 = vsel %vm1235_vm8, %v1231_v51, 0 }
 0x33f   :  { %v2805_v48 = vpop.eup %1644  ;;  %v1265_v35 = vsel %vm1252_vm10, %v1248_v29, 0 }
 0x340   :  { %v1087_v6 = vadd.f32 %v2805_v48, %v2801_v53  ;;  %v910_v46 = vand.u32 4294967168, %v2803_v50  ;;  %v878_v0 = vand.u32 127, %v2803_v50 }
 0x341   :  { %1456 = vxpose.xlu2.b32.cont [10/16] (narrow) %v1440_v55, 8 }
 0x342   :  { %vm926_vm7 = vcmp.lt.s32.totalorder %v910_v46, 0  ;;  %v942_v31 = vxor.u32 2147483647, %v910_v46  ;;  %1646 = vrcp.f32 %v1087_v6  ;;  %v894_v16 = vsub.s32 127, %v878_v0 }
 0x343   :  { %v803_v4 = vpop.xlane.xlu2 %802  ;;  %1648 = vpow2.f32 %v1020_v32  ;;  %v1364_v0 = vsel %vm1201_vm5, %v2718_v25, 0.0 }
 0x344   :  { %v958_v37 = vsel %vm926_vm7, %v942_v31, %v910_v46  ;;  %v804_v3 = vcvt.f32.s32 %v803_v4  ;;  %v1282_v31 = vsel %vm1269_vm11, %v1265_v35, 0 }
 0x345   :  { %v1038_v40 = vsub.f32 %v958_v37, %v590_v20  ;;  %v1198_v20 = vsel %vm1184_vm3, %v2938_v12, %v893_v2  ;;  %v1380_v12 = vsel %vm1218_vm6, %v1364_v0, 0.0 }
 0x346   :  { %v807_v17 = vadd.s32 %v806_v42, %v804_v3  ;;  %v1215_v15 = vsel %vm1201_vm5, %v1198_v20, 0  ;;  %v1299_v42 = vsel %vm1286_vm13, %v1282_v31, 0 }
 0x347   :  { %v1068_v13 = vmul.f32 1.442695, %v1038_v40  ;;  %v1232_v46 = vsel %vm1218_vm6, %v1215_v15, 0 }
 0x348   :  { %v875_v38 = vand.u32 127, %v807_v17  ;;  %v907_v56 = vand.u32 4294967168, %v807_v17  ;;  %v1647_v63 = vpop.eup %1646 }
 0x349   :  { %1650 = vpow2.f32 %v1068_v13  ;;  %1457 = vxpose.xlu2.b32.cont [11/16] (narrow) %v1441_v30, 8  ;;  %v1649_v47 = vpop.eup %1648  ;;  %v1119_v7 = vmul.f32 %v1647_v63, %v1087_v6 }
 0x34a   :  { %v891_v57 = vsub.s32 127, %v875_v38  ;;  %vm923_vm9 = vcmp.lt.s32.totalorder %v907_v56, 0  ;;  %v939_v60 = vxor.u32 2147483647, %v907_v56  ;;  %1652 = vpow2.f32 %v1014_v9 }
 0x34b   :  { %v1135_v44 = vsub.f32 2.0, %v1119_v7 }
 0x34c   :  { %v955_v21 = vsel %vm923_vm9, %v939_v60, %v907_v56  ;;  %v1196_v34 = vsel %vm1184_vm3, %v2937_v24, %v891_v57 }
 0x34d   :  { %v1035_v52 = vsub.f32 %v955_v21, %v587_v45  ;;  %v1213_v27 = vsel %vm1201_vm5, %v1196_v34, 0  ;;  %v1151_v1 = vmul.f32 %v1647_v63, %v1135_v44  ;;  %v1363_v21 = vsel %vm1201_vm5, %v2742_v26, 0.0 }
 0x34e   :  { %v1230_v18 = vsel %vm1218_vm6, %v1213_v27, 0  ;;  %v1379_v7 = vsel %vm1218_vm6, %v1363_v21, 0.0 }
 0x34f   :  { %v1651_v58 = vpop.eup %1650  ;;  %v1062_v19 = vmul.f32 1.442695, %v1035_v52  ;;  %v1247_v59 = vsel %vm1235_vm8, %v1230_v18, 0  ;;  %v1167_v36 = vmul.f32 %v2801_v53, %v1151_v1  ;;  %v1183_v50 = vmul.f32 %v2805_v48, %v1151_v1 }
 0x350   :  { %v1086_v8 = vadd.f32 %v1651_v58, %v1649_v47  ;;  %v1264_v49 = vsel %vm1252_vm10, %v1247_v59, 0  ;;  %v1653_v62 = vpop.eup %1652  ;;  %v1199_v53 = vsel %vm1184_vm3, %v2333_v43, %v894_v16  ;;  %v1249_v48 = vsel %vm1235_vm8, %v1232_v46, 0 }
 0x351   :  { %1654 = vpow2.f32 %v1062_v19  ;;  %v1281_v23 = vsel %vm1269_vm11, %v1264_v49, 0  ;;  %v2839_v6 = vsel %vm1184_vm3, %v1167_v36, %v1183_v50  ;;  %v1216_v4 = vsel %vm1201_vm5, %v1199_v53, 0 }
 0x352   :  { %v1298_v41 = vsel %vm1286_vm13, %v1281_v23, 0  ;;  %1656 = vrcp.f32 %v1086_v8  ;;  %v1266_v37 = vsel %vm1252_vm10, %v1249_v48, 0  ;;  %v1233_v40 = vsel %vm1218_vm6, %v1216_v4, 0 }
 0x353   :  { %1314 = vxpose.xlu1.b32.cont [12/16] (narrow) %v1298_v41, 8  ;;  %v1283_v39 = vsel %vm1269_vm11, %v1266_v37, 0  ;;  %v1200_v43 = vsel %vm1184_vm3, %v2303_v54, %v895_v5  ;;  %v1250_v33 = vsel %vm1235_vm8, %v1233_v40, 0  ;;  %v1395_v19 = vsel %vm1235_vm8, %v1379_v7, 0.0 }
 0x354   :  { %v1300_v38 = vsel %vm1286_vm13, %v1283_v39, 0  ;;  %v1217_v30 = vsel %vm1201_vm5, %v1200_v43, 0  ;;  %v1267_v63 = vsel %vm1252_vm10, %v1250_v33, 0  ;;  %v1396_v23 = vsel %vm1235_vm8, %v1380_v12, 0.0 }
 0x355   :  { %v1234_v9 = vsel %vm1218_vm6, %v1217_v30, 0  ;;  %v1284_v54 = vsel %vm1269_vm11, %v1267_v63, 0  ;;  %v1412_v41 = vsel %vm1252_vm10, %v1396_v23, 0.0  ;;  %v1366_v16 = vsel %vm1201_vm5, %v2839_v6, 0.0 }
 0x356   :  { %v1251_v34 = vsel %vm1235_vm8, %v1234_v9, 0  ;;  %v1428_v15 = vsel %vm1269_vm11, %v1412_v41, 0.0 }
 0x357   :  { %v1655_v55 = vpop.eup %1654  ;;  %v1268_v51 = vsel %vm1252_vm10, %v1251_v34, 0  ;;  %v1444_v50 = vsel %vm1286_vm13, %v1428_v15, 0.0 }
 0x358   :  { %v1083_v45 = vadd.f32 %v1655_v55, %v1653_v62  ;;  %v1657_v32 = vpop.eup %1656  ;;  %v1285_v44 = vsel %vm1269_vm11, %v1268_v51, 0 }
 0x359   :  { %v1118_v3 = vmul.f32 %v1657_v32, %v1086_v8  ;;  %v1411_v8 = vsel %vm1252_vm10, %v1395_v19, 0.0  ;;  %v1302_v49 = vsel %vm1286_vm13, %v1285_v44, 0 }
 0x35a   :  { %1658 = vrcp.f32 %v1083_v45  ;;  %v1427_v20 = vsel %vm1269_vm11, %v1411_v8, 0.0 }
 0x35b   :  { %1315 = vxpose.xlu1.b32.cont [13/16] (narrow) %v1299_v42, 8  ;;  %v1134_v14 = vsub.f32 2.0, %v1118_v3  ;;  %v1443_v29 = vsel %vm1286_vm13, %v1427_v20, 0.0 }
 0x35d   :  { %v1150_v13 = vmul.f32 %v1657_v32, %v1134_v14 }
 0x35f   :  { %v1166_v28 = vmul.f32 %v1649_v47, %v1150_v13  ;;  %v1182_v11 = vmul.f32 %v1651_v58, %v1150_v13  ;;  %v1301_v47 = vsel %vm1286_vm13, %v1284_v54, 0 }
 0x360   :  { %v1659_v17 = vpop.eup %1658 }
 0x361   :  { %v1115_v61 = vmul.f32 %v1659_v17, %v1083_v45  ;;  %v1349_v60 = vsel %vm1184_vm3, %v1166_v28, %v1182_v11 }
 0x362   :  { %v1365_v1 = vsel %vm1201_vm5, %v1349_v60, 0.0 }
 0x363   :  { %1316 = vxpose.xlu1.b32.cont [14/16] (narrow) %v1300_v38, 8  ;;  %v1131_v56 = vsub.f32 2.0, %v1115_v61  ;;  %v1381_v25 = vsel %vm1218_vm6, %v1365_v1, 0.0 }
 0x364   :  { %v1397_v36 = vsel %vm1235_vm8, %v1381_v25, 0.0 }
 0x365   :  { %v1147_v57 = vmul.f32 %v1659_v17, %v1131_v56  ;;  %v1413_v35 = vsel %vm1252_vm10, %v1397_v36, 0.0 }
 0x366   :  { %v1429_v46 = vsel %vm1269_vm11, %v1413_v35, 0.0 }
 0x367   :  { %v1163_v22 = vmul.f32 %v1653_v62, %v1147_v57  ;;  %v1179_v2 = vmul.f32 %v1655_v55, %v1147_v57  ;;  %v1382_v62 = vsel %vm1218_vm6, %v1366_v16, 0.0  ;;  %v1445_v31 = vsel %vm1286_vm13, %v1429_v46, 0.0 }
 0x368   :  { %v1398_v55 = vsel %vm1235_vm8, %v1382_v62, 0.0 }
 0x369   :  { %v1346_v24 = vsel %vm1184_vm3, %v1163_v22, %v1179_v2  ;;  %v1414_v10 = vsel %vm1252_vm10, %v1398_v55, 0.0 }
 0x36a   :  { %v1362_v52 = vsel %vm1201_vm5, %v1346_v24, 0.0  ;;  %v1430_v45 = vsel %vm1269_vm11, %v1414_v10, 0.0 }
 0x36b   :  { %1317 = vxpose.xlu1.b32.cont [15/16] (narrow) %v1301_v47, 8  ;;  %v1378_v27 = vsel %vm1218_vm6, %v1362_v52, 0.0  ;;  %v1446_v53 = vsel %vm1286_vm13, %v1430_v45, 0.0 }
 0x36c   :  { %v1394_v18 = vsel %vm1235_vm8, %v1378_v27, 0.0 }
 0x36d   :  { %v1410_v58 = vsel %vm1252_vm10, %v1394_v18, 0.0 }
 0x36e   :  { %v1426_v26 = vsel %vm1269_vm11, %v1410_v58, 0.0 }
 0x36f   :  { %v1442_v59 = vsel %vm1286_vm13, %v1426_v26, 0.0 }
 0x370   :  { %1458 = vxpose.xlu2.b32.cont [12/16] (narrow) %v1442_v59, 8 }
 0x373   :  { %1318 = vxpose.xlu1.b32.end [16/16] (narrow) %v1302_v49, 8 }
 0x378   :  { %1459 = vxpose.xlu2.b32.cont [13/16] (narrow) %v1443_v29, 8 }
 0x380   :  { %1460 = vxpose.xlu2.b32.cont [14/16] (narrow) %v1444_v50, 8 }
 0x388   :  { %1461 = vxpose.xlu2.b32.cont [15/16] (narrow) %v1445_v31, 8 }
 0x390   :  { %1462 = vxpose.xlu2.b32.end [16/16] (narrow) %v1446_v53, 8 }
 0x39f   :  { %v1319_v6 = vpop.trf.xlu1 }
 0x3a0   :  { %1479 = vst [vmem:[#allocation2] sm:$0x3] %v1319_v6 }
 0x3a1   :  { %1491 = dma.vmem_to_hbm [thread:$0]  %s1487_s2, 32, %s1489_s10, [#allocation3]  }
 0x3b1   :  { %v1463_v48 = vpop.trf.xlu2 }
 0x3b2   :  { %1480 = vst [vmem:[#allocation4] sm:$0x3] %v1463_v48 }
 0x3b3   :  { %1502 = dma.vmem_to_hbm [thread:$0]  %s1498_s12, 32, %s1500_s15, [#allocation5]  }
 0x3b4   :  { %1515 = dma.vmem_to_hbm [thread:$0]  %s1508_s17, 2048, %s1510_s20, [#allocation5], %s1739_s3, %s1739_s3, %s1740_s21  }
 0x3b5   :  { %1732 = dma.done.wait [#allocation3], 32  }
 0x3b6   :  { %1733 = vsyncadd [#allocation3], 4294967264 }
 0x3b7   :  { %1734 = dma.done.wait [#allocation5], 2080  }
 0x3b8   :  { %1735 = vsyncadd [#allocation5], 4294965216 }
 0x3b9   :  { %1528 = vsyncpa [#allocation3], 1 }
 0x3ba   :  { %1529 = vsyncpa [#allocation5], 1 }

</bundles_post_ra>
